<compile_context>
chip_gen: v6e
topology: v6e:2x2x1
jax: 0.10.0
libtpu: 0.0.40
codegen_flags: <defaults>
</compile_context>

<pallas_src>
import math
from functools import partial
from dataclasses import dataclass

import jax
import jax.numpy as jnp
from jax.experimental import pallas as pl
from jax.experimental.pallas import tpu as pltpu


# ----------------------------- config ---------------------------------------

@dataclass
class ModelArgs:
    dim: int = 64
    n_layers: int = 2
    n_heads: int = 4
    vocab_size: int = 128
    multiple_of: int = 32
    norm_eps: float = 1e-5
    max_seq_len: int = 64


COMPUTE_DTYPE = jnp.bfloat16          # MXU inputs / stored activations+weights
_VMEM_LIMIT_BYTES = 32 * 1024 * 1024  # fits v7x's 64 MiB physical VMEM budget

_LANE_TILES = (512, 256, 128)         # preferred tiles for lane (last) dims
_SUB_TILES = (256, 128)               # preferred tiles for sublane (row) dims


def _pick_tile(n, candidates):
    for c in candidates:
        if n % c == 0:
            return c
    return n                          # full dim (always a legal block size)


def _cparams(semantics):
    return pltpu.CompilerParams(dimension_semantics=semantics,
                                vmem_limit_bytes=_VMEM_LIMIT_BYTES)


# ----------------------------- kernels ---------------------------------------

def _norm_matmul_kernel(x_ref, nw_ref, w_ref, o_ref, *, eps):
    # o = rmsnorm(x; nw) @ w   (norm math in f32, MXU inputs in w.dtype)
    x = x_ref[...].astype(jnp.float32)
    ms = jnp.mean(x * x, axis=-1, keepdims=True)
    xn = x * jax.lax.rsqrt(ms + eps) * nw_ref[...].astype(jnp.float32)
    o_ref[...] = jnp.dot(xn.astype(w_ref.dtype), w_ref[...],
                         preferred_element_type=jnp.float32).astype(o_ref.dtype)


def _matmul_residual_kernel(x_ref, w_ref, r_ref, o_ref):
    # o = x @ w + r   (residual add fused into the matmul epilogue)
    acc = jnp.dot(x_ref[...], w_ref[...], preferred_element_type=jnp.float32)
    o_ref[...] = (acc + r_ref[...].astype(jnp.float32)).astype(o_ref.dtype)


def _attention_kernel(qkv_ref, cos_ref, sin_ref, o_ref,
                      *, n_heads, head_dim, dim, scale):
    # One batch element per grid step; qkv_ref: (S, 3D) lane-dense, o_ref: (S, D).
    # RoPE fused in: with q=[q1,q2], rotate_half(q)=[-q2,q1] and cos=[c,c],
    # sin=[s,s]  =>  q_emb=[q1*c-q2*s, q2*c+q1*s]; the concat never has to be
    # materialized because scores = a@e^T + b@f^T.
    # TODO(synk): attention_mask / causal-mask path (reference runs with
    #             attention_mask=None, so mask is None here as well).
    half = head_dim // 2
    c = cos_ref[...]                      # (S, half) f32
    s = sin_ref[...]                      # (S, half) f32
    for h in range(n_heads):
        qo = h * head_dim
        ko = dim + h * head_dim
        vo = 2 * dim + h * head_dim
        q1 = qkv_ref[:, qo:qo + half].astype(jnp.float32) * scale
        q2 = qkv_ref[:, qo + half:qo + head_dim].astype(jnp.float32) * scale
        k1 = qkv_ref[:, ko:ko + half].astype(jnp.float32)
        k2 = qkv_ref[:, ko + half:ko + head_dim].astype(jnp.float32)
        v = qkv_ref[:, vo:vo + head_dim]
        a = q1 * c - q2 * s               # first half of rotated q (pre-scaled)
        b = q2 * c + q1 * s               # second half of rotated q
        e = k1 * c - k2 * s               # first half of rotated k
        f = k2 * c + k1 * s               # second half of rotated k
        dn = (((1,), (1,)), ((), ()))
        scores = (jax.lax.dot_general(a, e, dn, preferred_element_type=jnp.float32)
                  + jax.lax.dot_general(b, f, dn, preferred_element_type=jnp.float32))
        scores = scores - jnp.max(scores, axis=-1, keepdims=True)
        p = jnp.exp(scores)
        p = p * pl.reciprocal(jnp.sum(p, axis=-1, keepdims=True), approx=True)
        out_h = jnp.dot(p.astype(v.dtype), v, preferred_element_type=jnp.float32)
        o_ref[:, qo:qo + head_dim] = out_h.astype(o_ref.dtype)


def _ffn_kernel(x_ref, nw_ref, w1_ref, w3_ref, w2_ref, o_ref, acc_ref, xn_ref,
                *, eps):
    # out = x + w2(silu(rmsnorm(x) @ w1) * (rmsnorm(x) @ w3))
    # grid = (M tiles, hidden tiles); hidden axis is the reduction axis.
    j = pl.program_id(1)

    @pl.when(j == 0)
    def _():
        x = x_ref[...].astype(jnp.float32)
        ms = jnp.mean(x * x, axis=-1, keepdims=True)
        xn = x * jax.lax.rsqrt(ms + eps) * nw_ref[...].astype(jnp.float32)
        xn_ref[...] = xn.astype(xn_ref.dtype)
        acc_ref[...] = x                      # accumulator starts at the residual

    xn = xn_ref[...]
    h1 = jnp.dot(xn, w1_ref[...], preferred_element_type=jnp.float32)
    h3 = jnp.dot(xn, w3_ref[...], preferred_element_type=jnp.float32)
    g = (h1 * jax.nn.sigmoid(h1)) * h3
    acc_ref[...] += jnp.dot(g.astype(w2_ref.dtype), w2_ref[...],
                            preferred_element_type=jnp.float32)

    @pl.when(j == pl.num_programs(1) - 1)
    def _():
        o_ref[...] = acc_ref[...].astype(o_ref.dtype)


# ----------------------------- wrappers ---------------------------------------

def norm_matmul(x2d, norm_w, w_t, eps, out_dtype):
    M, K = x2d.shape
    _, N = w_t.shape
    tm = _pick_tile(M, _SUB_TILES)
    tn = _pick_tile(N, _LANE_TILES)
    return pl.pallas_call(
        partial(_norm_matmul_kernel, eps=eps),
        out_shape=jax.ShapeDtypeStruct((M, N), out_dtype),
        grid=(M // tm, N // tn),
        in_specs=[
            pl.BlockSpec((tm, K), lambda i, j: (i, 0)),
            pl.BlockSpec((1, K), lambda i, j: (0, 0)),
            pl.BlockSpec((K, tn), lambda i, j: (0, j)),
        ],
        out_specs=pl.BlockSpec((tm, tn), lambda i, j: (i, j)),
        compiler_params=_cparams(("parallel", "parallel")),
    )(x2d, norm_w, w_t)


def matmul_residual(x2d, w_t, res2d, out_dtype):
    M, K = x2d.shape
    _, N = w_t.shape
    tm = _pick_tile(M, _SUB_TILES)
    tn = _pick_tile(N, _LANE_TILES)
    return pl.pallas_call(
        _matmul_residual_kernel,
        out_shape=jax.ShapeDtypeStruct((M, N), out_dtype),
        grid=(M // tm, N // tn),
        in_specs=[
            pl.BlockSpec((tm, K), lambda i, j: (i, 0)),
            pl.BlockSpec((K, tn), lambda i, j: (0, j)),
            pl.BlockSpec((tm, tn), lambda i, j: (i, j)),
        ],
        out_specs=pl.BlockSpec((tm, tn), lambda i, j: (i, j)),
        compiler_params=_cparams(("parallel", "parallel")),
    )(x2d, w_t, res2d)


def attention_core(qkv3, cos_half, sin_half, n_heads):
    # qkv3: (B, S, 3D) — q,k,v already projected and packed along the last dim.
    B, S, threeD = qkv3.shape
    D = threeD // 3
    Dh = D // n_heads
    half = Dh // 2
    scale = 1.0 / math.sqrt(Dh)
    kernel = partial(_attention_kernel, n_heads=n_heads, head_dim=Dh, dim=D,
                     scale=scale)
    return pl.pallas_call(
        kernel,
        out_shape=jax.ShapeDtypeStruct((B, S, D), qkv3.dtype),
        grid=(B,),
        in_specs=[
            pl.BlockSpec((None, S, threeD), lambda b: (b, 0, 0)),
            pl.BlockSpec((S, half), lambda b: (0, 0)),
            pl.BlockSpec((S, half), lambda b: (0, 0)),
        ],
        out_specs=pl.BlockSpec((None, S, D), lambda b: (b, 0, 0)),
        compiler_params=_cparams(("parallel",)),
    )(qkv3, cos_half, sin_half)


def ffn_fused(x2d, norm_w, w1_t, w3_t, w2_t, eps, out_dtype):
    M, D = x2d.shape
    Hd = w1_t.shape[1]
    tm = _pick_tile(M, _SUB_TILES)
    th = _pick_tile(Hd, _LANE_TILES)       # tile the hidden (reduction) dim
    return pl.pallas_call(
        partial(_ffn_kernel, eps=eps),
        out_shape=jax.ShapeDtypeStruct((M, D), out_dtype),
        grid=(M // tm, Hd // th),
        in_specs=[
            pl.BlockSpec((tm, D), lambda i, j: (i, 0)),
            pl.BlockSpec((1, D), lambda i, j: (0, 0)),
            pl.BlockSpec((D, th), lambda i, j: (0, j)),
            pl.BlockSpec((D, th), lambda i, j: (0, j)),
            pl.BlockSpec((th, D), lambda i, j: (j, 0)),
        ],
        out_specs=pl.BlockSpec((tm, D), lambda i, j: (i, 0)),
        scratch_shapes=[pltpu.VMEM((tm, D), jnp.float32),
                        pltpu.VMEM((tm, D), COMPUTE_DTYPE)],
        compiler_params=_cparams(("parallel", "arbitrary")),
    )(x2d, norm_w, w1_t, w3_t, w2_t)


# ----------------------------- RoPE tables (glue) ------------------------------

def rope_tables(max_seq_len, head_dim, base=10000.0):
    half = head_dim // 2
    inv_freq = 1.0 / (base ** (jnp.arange(0, head_dim, 2, dtype=jnp.float32)
                               / head_dim))
    t = jnp.arange(max_seq_len, dtype=jnp.float32)
    freqs = jnp.einsum("i,j->ij", t, inv_freq)          # (S_max, half)
    return jnp.cos(freqs), jnp.sin(freqs)               # half-width tables


# ----------------------------- params ------------------------------------------

def init_params(key, cfg: ModelArgs):
    """PyTorch-layout (out_features, in_features) float32 weights."""
    D, V = cfg.dim, cfg.vocab_size
    hidden = int(2 * (4 * D) / 3)
    hidden = cfg.multiple_of * ((hidden + cfg.multiple_of - 1) // cfg.multiple_of)

    def w(k, shape, scale=0.02):
        return scale * jax.random.normal(k, shape, dtype=jnp.float32)

    keys = jax.random.split(key, 2 + 8 * cfg.n_layers)
    params = {
        "tok_embeddings": w(keys[0], (V, D)),
        "norm": jnp.ones((D,), jnp.float32),
        "output": w(keys[1], (V, D)),
        "layers": [],
    }
    ki = 2
    for _ in range(cfg.n_layers):
        params["layers"].append({
            "wq": w(keys[ki + 0], (D, D)),
            "wk": w(keys[ki + 1], (D, D)),
            "wv": w(keys[ki + 2], (D, D)),
            "wo": w(keys[ki + 3], (D, D)),
            "w1": w(keys[ki + 4], (hidden, D)),
            "w2": w(keys[ki + 5], (D, hidden)),
            "w3": w(keys[ki + 6], (hidden, D)),
            "attention_norm": jnp.ones((D,), jnp.float32),
            "ffn_norm": jnp.ones((D,), jnp.float32),
        })
        ki += 8
    return params


def prepare_params(params, cfg: ModelArgs):
    """One-time: transpose to (in,out), fuse QKV, cast to bf16, build rope tables."""
    cdt = COMPUTE_DTYPE
    Dh = cfg.dim // cfg.n_heads
    cos, sin = rope_tables(cfg.max_seq_len, Dh)
    prepared = {
        "tok_embeddings": params["tok_embeddings"].astype(cdt),
        "norm": params["norm"].reshape(1, -1).astype(cdt),
        "output_t": params["output"].T.astype(cdt),
        "rope_cos": cos,
        "rope_sin": sin,
        "layers": [],
    }
    for layer in params["layers"]:
        wqkv_t = jnp.concatenate(
            [layer["wq"].T, layer["wk"].T, layer["wv"].T], axis=1).astype(cdt)
        prepared["layers"].append({
            "wqkv_t": wqkv_t,
            "wo_t": layer["wo"].T.astype(cdt),
            "w1_t": layer["w1"].T.astype(cdt),
            "w2_t": layer["w2"].T.astype(cdt),
            "w3_t": layer["w3"].T.astype(cdt),
            "attention_norm": layer["attention_norm"].reshape(1, -1).astype(cdt),
            "ffn_norm": layer["ffn_norm"].reshape(1, -1).astype(cdt),
        })
    return prepared


# ----------------------------- model forward -----------------------------------

def transformer_forward(prepared, cfg: ModelArgs, input_ids):
    B, S = input_ids.shape
    D = cfg.dim
    M = B * S

    h = prepared["tok_embeddings"][input_ids]        # embedding gather (glue)
    cos = prepared["rope_cos"][:S]                   # position_ids = arange(S)
    sin = prepared["rope_sin"][:S]

    for layer in prepared["layers"]:
        x2d = h.reshape(M, D)
        # 1) fused attention_norm + QKV projection
        qkv = norm_matmul(x2d, layer["attention_norm"], layer["wqkv_t"],
                          cfg.norm_eps, COMPUTE_DTYPE)            # (M, 3D)
        # 2) attention core (RoPE fused), per-batch lane-dense blocks
        attn = attention_core(qkv.reshape(B, S, 3 * D), cos, sin,
                              cfg.n_heads)                        # (B, S, D)
        # 3) wo projection + residual add
        h2d = matmul_residual(attn.reshape(M, D), layer["wo_t"], x2d,
                              COMPUTE_DTYPE)                      # (M, D)
        # 4) fused ffn_norm + SwiGLU FFN + residual add
        out2d = ffn_fused(h2d, layer["ffn_norm"], layer["w1_t"], layer["w3_t"],
                          layer["w2_t"], cfg.norm_eps, COMPUTE_DTYPE)
        h = out2d.reshape(B, S, D)

    # final norm + output projection (logits in float32, as in the reference)
    logits = norm_matmul(h.reshape(M, D), prepared["norm"], prepared["output_t"],
                         cfg.norm_eps, jnp.float32)
    return logits.reshape(B, S, cfg.vocab_size)


# ----------------------------- main --------------------------------------------

if __name__ == "__main__":
    cfg = ModelArgs(dim=64, n_layers=2, n_heads=4, vocab_size=128,
                    multiple_of=32, norm_eps=1e-5, max_seq_len=64)
    key = jax.random.PRNGKey(0)
    pkey, dkey = jax.random.split(key)

    params = init_params(pkey, cfg)
    prepared = prepare_params(params, cfg)

    B, S = 2, 8
    input_ids = jax.random.randint(dkey, (B, S), 0, cfg.vocab_size,
                                   dtype=jnp.int32)

    fwd = jax.jit(partial(transformer_forward, prepared, cfg))
    logits = fwd(input_ids)
    jax.block_until_ready(logits)

    assert logits.shape == (B, S, cfg.vocab_size)
    assert logits.dtype == jnp.float32
    assert bool(jnp.all(jnp.isfinite(logits)))
    print("KERNEL_OK")
</pallas_src>

<mosaic_0001>
module attributes {stable_mosaic.version = 11 : i64} {
  func.func @_matmul_residual_kernel(%arg0: i32, %arg1: i32, %arg2: memref<16x64xbf16, #tpu.memory_space<vmem>>, %arg3: memref<64x64xbf16, #tpu.memory_space<vmem>>, %arg4: memref<16x64xbf16, #tpu.memory_space<vmem>>, %arg5: memref<16x64xbf16, #tpu.memory_space<vmem>>) attributes {dimension_semantics = [#tpu.dimension_semantics<parallel>, #tpu.dimension_semantics<parallel>], iteration_bounds = array<i64: 1, 1>, scalar_prefetch = 0 : i64, scratch_operands = 0 : i64, tpu.core_type = #tpu.core_type<tc>, window_params = [{transform_indices = @transform_0, window_bounds = array<i64: 16, 64>}, {transform_indices = @transform_1, window_bounds = array<i64: 64, 64>}, {transform_indices = @transform_2, window_bounds = array<i64: 16, 64>}, {transform_indices = @transform_3, window_bounds = array<i64: 16, 64>}]} {
    %c0 = arith.constant 0 : index
    %c0_0 = arith.constant 0 : index
    %0 = vector.load %arg2[%c0, %c0_0] : memref<16x64xbf16, #tpu.memory_space<vmem>>, vector<16x64xbf16>
    %c0_1 = arith.constant 0 : index
    %c0_2 = arith.constant 0 : index
    %1 = vector.load %arg3[%c0_1, %c0_2] : memref<64x64xbf16, #tpu.memory_space<vmem>>, vector<64x64xbf16>
    %cst = arith.constant dense<0.000000e+00> : vector<16x64xf32>
    %2 = tpu.matmul %0, %1, %cst {dimension_numbers = #tpu.dot_dimension_numbers<[1], [0], [0], [1], [0, 0, 1, 1], [], []>} : vector<16x64xbf16>, vector<64x64xbf16>, vector<16x64xf32> -> vector<16x64xf32>
    %c0_3 = arith.constant 0 : index
    %c0_4 = arith.constant 0 : index
    %3 = vector.load %arg4[%c0_3, %c0_4] : memref<16x64xbf16, #tpu.memory_space<vmem>>, vector<16x64xbf16>
    %4 = arith.extf %3 : vector<16x64xbf16> to vector<16x64xf32>
    %5 = arith.addf %2, %4 : vector<16x64xf32>
    %6 = arith.truncf %5 : vector<16x64xf32> to vector<16x64xbf16>
    %c0_5 = arith.constant 0 : index
    %c0_6 = arith.constant 0 : index
    %7 = vector.load %arg5[%c0_5, %c0_6] : memref<16x64xbf16, #tpu.memory_space<vmem>>, vector<16x64xbf16>
    tpu.vector_store %arg5[%c0_5, %c0_6], %6 {strides = array<i32>} : memref<16x64xbf16, #tpu.memory_space<vmem>>, vector<16x64xbf16>,
    return
  }
  func.func @transform_0(%arg0: i32, %arg1: i32) -> (i32, i32) {
    %c0_i32 = arith.constant 0 : i32
    %c0_i32_0 = arith.constant 0 : i32
    return %arg0, %c0_i32 : i32, i32
  }
  func.func @transform_1(%arg0: i32, %arg1: i32) -> (i32, i32) {
    %c0_i32 = arith.constant 0 : i32
    %c0_i32_0 = arith.constant 0 : i32
    return %c0_i32, %arg1 : i32, i32
  }
  func.func @transform_2(%arg0: i32, %arg1: i32) -> (i32, i32) {
    %c0_i32 = arith.constant 0 : i32
    return %arg0, %arg1 : i32, i32
  }
  func.func @transform_3(%arg0: i32, %arg1: i32) -> (i32, i32) {
    %c0_i32 = arith.constant 0 : i32
    return %arg0, %arg1 : i32, i32
  }
}

module attributes {stable_mosaic.version = 11 : i64} {
  func.func @_ffn_kernel(%arg0: i32, %arg1: i32, %arg2: memref<16x64xbf16, #tpu.memory_space<vmem>>, %arg3: memref<1x64xbf16, #tpu.memory_space<vmem>>, %arg4: memref<64x192xbf16, #tpu.memory_space<vmem>>, %arg5: memref<64x192xbf16, #tpu.memory_space<vmem>>, %arg6: memref<192x64xbf16, #tpu.memory_space<vmem>>, %arg7: memref<16x64xbf16, #tpu.memory_space<vmem>>, %arg8: memref<16x64xf32, #tpu.memory_space<vmem>>, %arg9: memref<16x64xbf16, #tpu.memory_space<vmem>>) attributes {dimension_semantics = [#tpu.dimension_semantics<parallel>, #tpu.dimension_semantics<arbitrary>], iteration_bounds = array<i64: 1, 1>, scalar_prefetch = 0 : i64, scratch_operands = 2 : i64, tpu.core_type = #tpu.core_type<tc>, window_params = [{transform_indices = @transform_0, window_bounds = array<i64: 16, 64>}, {pipeline_mode = #tpu.pipeline_mode<synchronous>, transform_indices = @transform_1, window_bounds = array<i64: 1, 64>}, {transform_indices = @transform_2, window_bounds = array<i64: 64, 192>}, {transform_indices = @transform_3, window_bounds = array<i64: 64, 192>}, {transform_indices = @transform_4, window_bounds = array<i64: 192, 64>}, {transform_indices = @transform_5, window_bounds = array<i64: 16, 64>}]} {
    %c0_i32 = arith.constant 0 : i32
    %0 = arith.cmpi eq, %arg1, %c0_i32 : i32
    %1 = arith.extui %0 : i1 to i32
    %c0_i32_0 = arith.constant 0 : i32
    %2 = arith.cmpi ne, %1, %c0_i32_0 : i32
    scf.if %2 {
      %c0_17 = arith.constant 0 : index
      %c0_18 = arith.constant 0 : index
      %24 = vector.load %arg2[%c0_17, %c0_18] : memref<16x64xbf16, #tpu.memory_space<vmem>>, vector<16x64xbf16>
      %25 = arith.extf %24 : vector<16x64xbf16> to vector<16x64xf32>
      %26 = arith.mulf %25, %25 : vector<16x64xf32>
      %cst_19 = arith.constant dense<0.000000e+00> : vector<16xf32>
      %27 = vector.multi_reduction <add>, %26, %cst_19 [1] : vector<16x64xf32> to vector<16xf32>
      %28 = vector.shape_cast %27 : vector<16xf32> to vector<16x1xf32>
      %cst_20 = arith.constant 6.400000e+01 : f32
      %29 = vector.broadcast %cst_20 : f32 to vector<16x1xf32>
      %30 = arith.divf %28, %29 : vector<16x1xf32>
      %cst_21 = arith.constant 9.99999974E-6 : f32
      %31 = vector.broadcast %cst_21 : f32 to vector<16x1xf32>
      %32 = arith.addf %30, %31 : vector<16x1xf32>
      %33 = math.rsqrt %32 : vector<16x1xf32>
      %34 = vector.broadcast %33 : vector<16x1xf32> to vector<16x64xf32>
      %35 = arith.mulf %25, %34 : vector<16x64xf32>
      %c0_22 = arith.constant 0 : index
      %c0_23 = arith.constant 0 : index
      %36 = vector.load %arg3[%c0_22, %c0_23] : memref<1x64xbf16, #tpu.memory_space<vmem>>, vector<1x64xbf16>
      %37 = arith.extf %36 : vector<1x64xbf16> to vector<1x64xf32>
      %38 = vector.broadcast %37 : vector<1x64xf32> to vector<16x64xf32>
      %39 = arith.mulf %35, %38 : vector<16x64xf32>
      %40 = arith.truncf %39 : vector<16x64xf32> to vector<16x64xbf16>
      %c0_24 = arith.constant 0 : index
      %c0_25 = arith.constant 0 : index
      %41 = vector.load %arg9[%c0_24, %c0_25] : memref<16x64xbf16, #tpu.memory_space<vmem>>, vector<16x64xbf16>
      tpu.vector_store %arg9[%c0_24, %c0_25], %40 {strides = array<i32>} : memref<16x64xbf16, #tpu.memory_space<vmem>>, vector<16x64xbf16>,
      %c0_26 = arith.constant 0 : index
      %c0_27 = arith.constant 0 : index
      %42 = vector.load %arg8[%c0_26, %c0_27] : memref<16x64xf32, #tpu.memory_space<vmem>>, vector<16x64xf32>
      tpu.vector_store %arg8[%c0_26, %c0_27], %25 {strides = array<i32>} : memref<16x64xf32, #tpu.memory_space<vmem>>, vector<16x64xf32>,
    } else {
    }
    %c0 = arith.constant 0 : index
    %c0_1 = arith.constant 0 : index
    %3 = vector.load %arg9[%c0, %c0_1] : memref<16x64xbf16, #tpu.memory_space<vmem>>, vector<16x64xbf16>
    %c0_2 = arith.constant 0 : index
    %c0_3 = arith.constant 0 : index
    %4 = vector.load %arg4[%c0_2, %c0_3] : memref<64x192xbf16, #tpu.memory_space<vmem>>, vector<64x192xbf16>
    %cst = arith.constant dense<0.000000e+00> : vector<16x192xf32>
    %5 = tpu.matmul %3, %4, %cst {dimension_numbers = #tpu.dot_dimension_numbers<[1], [0], [0], [1], [0, 0, 1, 1], [], []>} : vector<16x64xbf16>, vector<64x192xbf16>, vector<16x192xf32> -> vector<16x192xf32>
    %c0_4 = arith.constant 0 : index
    %c0_5 = arith.constant 0 : index
    %6 = vector.load %arg5[%c0_4, %c0_5] : memref<64x192xbf16, #tpu.memory_space<vmem>>, vector<64x192xbf16>
    %cst_6 = arith.constant dense<0.000000e+00> : vector<16x192xf32>
    %7 = tpu.matmul %3, %6, %cst_6 {dimension_numbers = #tpu.dot_dimension_numbers<[1], [0], [0], [1], [0, 0, 1, 1], [], []>} : vector<16x64xbf16>, vector<64x192xbf16>, vector<16x192xf32> -> vector<16x192xf32>
    %8 = arith.negf %5 : vector<16x192xf32>
    %9 = math.exp %8 : vector<16x192xf32>
    %cst_7 = arith.constant 1.000000e+00 : f32
    %10 = vector.broadcast %cst_7 : f32 to vector<16x192xf32>
    %11 = arith.addf %10, %9 : vector<16x192xf32>
    %12 = arith.divf %10, %11 : vector<16x192xf32>
    %13 = arith.mulf %5, %12 : vector<16x192xf32>
    %14 = arith.mulf %13, %7 : vector<16x192xf32>
    %c0_8 = arith.constant 0 : index
    %c0_9 = arith.constant 0 : index
    %15 = vector.load %arg8[%c0_8, %c0_9] : memref<16x64xf32, #tpu.memory_space<vmem>>, vector<16x64xf32>
    %16 = arith.truncf %14 : vector<16x192xf32> to vector<16x192xbf16>
    %c0_10 = arith.constant 0 : index
    %c0_11 = arith.constant 0 : index
    %17 = vector.load %arg6[%c0_10, %c0_11] : memref<192x64xbf16, #tpu.memory_space<vmem>>, vector<192x64xbf16>
    %cst_12 = arith.constant dense<0.000000e+00> : vector<16x64xf32>
    %18 = tpu.matmul %16, %17, %cst_12 {dimension_numbers = #tpu.dot_dimension_numbers<[1], [0], [0], [1], [0, 0, 1, 1], [], []>} : vector<16x192xbf16>, vector<192x64xbf16>, vector<16x64xf32> -> vector<16x64xf32>
    %19 = arith.addf %15, %18 : vector<16x64xf32>
    %c0_13 = arith.constant 0 : index
    %c0_14 = arith.constant 0 : index
    %20 = vector.load %arg8[%c0_13, %c0_14] : memref<16x64xf32, #tpu.memory_space<vmem>>, vector<16x64xf32>
    tpu.vector_store %arg8[%c0_13, %c0_14], %19 {strides = array<i32>} : memref<16x64xf32, #tpu.memory_space<vmem>>, vector<16x64xf32>,
    %c0_i32_15 = arith.constant 0 : i32
    %21 = arith.cmpi eq, %arg1, %c0_i32_15 : i32
    %22 = arith.extui %21 : i1 to i32
    %c0_i32_16 = arith.constant 0 : i32
    %23 = arith.cmpi ne, %22, %c0_i32_16 : i32
    scf.if %23 {
      %c0_17 = arith.constant 0 : index
      %c0_18 = arith.constant 0 : index
      %24 = vector.load %arg8[%c0_17, %c0_18] : memref<16x64xf32, #tpu.memory_space<vmem>>, vector<16x64xf32>
      %25 = arith.truncf %24 : vector<16x64xf32> to vector<16x64xbf16>
      %c0_19 = arith.constant 0 : index
      %c0_20 = arith.constant 0 : index
      %26 = vector.load %arg7[%c0_19, %c0_20] : memref<16x64xbf16, #tpu.memory_space<vmem>>, vector<16x64xbf16>
      tpu.vector_store %arg7[%c0_19, %c0_20], %25 {strides = array<i32>} : memref<16x64xbf16, #tpu.memory_space<vmem>>, vector<16x64xbf16>,
    } else {
    }
    return
  }
  func.func @transform_0(%arg0: i32, %arg1: i32) -> (i32, i32) {
    %c0_i32 = arith.constant 0 : i32
    %c0_i32_0 = arith.constant 0 : i32
    return %arg0, %c0_i32 : i32, i32
  }
  func.func @transform_1(%arg0: i32, %arg1: i32) -> (i32, i32) {
    %c0_i32 = arith.constant 0 : i32
    %c0_i32_0 = arith.constant 0 : i32
    %c0_i32_1 = arith.constant 0 : i32
    return %c0_i32, %c0_i32_0 : i32, i32
  }
  func.func @transform_2(%arg0: i32, %arg1: i32) -> (i32, i32) {
    %c0_i32 = arith.constant 0 : i32
    %c0_i32_0 = arith.constant 0 : i32
    return %c0_i32, %arg1 : i32, i32
  }
  func.func @transform_3(%arg0: i32, %arg1: i32) -> (i32, i32) {
    %c0_i32 = arith.constant 0 : i32
    %c0_i32_0 = arith.constant 0 : i32
    return %c0_i32, %arg1 : i32, i32
  }
  func.func @transform_4(%arg0: i32, %arg1: i32) -> (i32, i32) {
    %c0_i32 = arith.constant 0 : i32
    %c0_i32_0 = arith.constant 0 : i32
    return %arg1, %c0_i32 : i32, i32
  }
  func.func @transform_5(%arg0: i32, %arg1: i32) -> (i32, i32) {
    %c0_i32 = arith.constant 0 : i32
    %c0_i32_0 = arith.constant 0 : i32
    return %arg0, %c0_i32 : i32, i32
  }
}

module attributes {stable_mosaic.version = 11 : i64} {
  func.func @_norm_matmul_kernel(%arg0: i32, %arg1: i32, %arg2: memref<16x64xbf16, #tpu.memory_space<vmem>>, %arg3: memref<1x64xbf16, #tpu.memory_space<vmem>>, %arg4: memref<64x192xbf16, #tpu.memory_space<vmem>>, %arg5: memref<16x192xbf16, #tpu.memory_space<vmem>>) attributes {dimension_semantics = [#tpu.dimension_semantics<parallel>, #tpu.dimension_semantics<parallel>], iteration_bounds = array<i64: 1, 1>, scalar_prefetch = 0 : i64, scratch_operands = 0 : i64, tpu.core_type = #tpu.core_type<tc>, window_params = [{transform_indices = @transform_0, window_bounds = array<i64: 16, 64>}, {pipeline_mode = #tpu.pipeline_mode<synchronous>, transform_indices = @transform_1, window_bounds = array<i64: 1, 64>}, {transform_indices = @transform_2, window_bounds = array<i64: 64, 192>}, {transform_indices = @transform_3, window_bounds = array<i64: 16, 192>}]} {
    %c0 = arith.constant 0 : index
    %c0_0 = arith.constant 0 : index
    %0 = vector.load %arg2[%c0, %c0_0] : memref<16x64xbf16, #tpu.memory_space<vmem>>, vector<16x64xbf16>
    %1 = arith.extf %0 : vector<16x64xbf16> to vector<16x64xf32>
    %2 = arith.mulf %1, %1 : vector<16x64xf32>
    %cst = arith.constant dense<0.000000e+00> : vector<16xf32>
    %3 = vector.multi_reduction <add>, %2, %cst [1] : vector<16x64xf32> to vector<16xf32>
    %4 = vector.shape_cast %3 : vector<16xf32> to vector<16x1xf32>
    %cst_1 = arith.constant 6.400000e+01 : f32
    %5 = vector.broadcast %cst_1 : f32 to vector<16x1xf32>
    %6 = arith.divf %4, %5 : vector<16x1xf32>
    %cst_2 = arith.constant 9.99999974E-6 : f32
    %7 = vector.broadcast %cst_2 : f32 to vector<16x1xf32>
    %8 = arith.addf %6, %7 : vector<16x1xf32>
    %9 = math.rsqrt %8 : vector<16x1xf32>
    %10 = vector.broadcast %9 : vector<16x1xf32> to vector<16x64xf32>
    %11 = arith.mulf %1, %10 : vector<16x64xf32>
    %c0_3 = arith.constant 0 : index
    %c0_4 = arith.constant 0 : index
    %12 = vector.load %arg3[%c0_3, %c0_4] : memref<1x64xbf16, #tpu.memory_space<vmem>>, vector<1x64xbf16>
    %13 = arith.extf %12 : vector<1x64xbf16> to vector<1x64xf32>
    %14 = vector.broadcast %13 : vector<1x64xf32> to vector<16x64xf32>
    %15 = arith.mulf %11, %14 : vector<16x64xf32>
    %16 = arith.truncf %15 : vector<16x64xf32> to vector<16x64xbf16>
    %c0_5 = arith.constant 0 : index
    %c0_6 = arith.constant 0 : index
    %17 = vector.load %arg4[%c0_5, %c0_6] : memref<64x192xbf16, #tpu.memory_space<vmem>>, vector<64x192xbf16>
    %cst_7 = arith.constant dense<0.000000e+00> : vector<16x192xf32>
    %18 = tpu.matmul %16, %17, %cst_7 {dimension_numbers = #tpu.dot_dimension_numbers<[1], [0], [0], [1], [0, 0, 1, 1], [], []>} : vector<16x64xbf16>, vector<64x192xbf16>, vector<16x192xf32> -> vector<16x192xf32>
    %19 = arith.truncf %18 : vector<16x192xf32> to vector<16x192xbf16>
    %c0_8 = arith.constant 0 : index
    %c0_9 = arith.constant 0 : index
    %20 = vector.load %arg5[%c0_8, %c0_9] : memref<16x192xbf16, #tpu.memory_space<vmem>>, vector<16x192xbf16>
    tpu.vector_store %arg5[%c0_8, %c0_9], %19 {strides = array<i32>} : memref<16x192xbf16, #tpu.memory_space<vmem>>, vector<16x192xbf16>,
    return
  }
  func.func @transform_0(%arg0: i32, %arg1: i32) -> (i32, i32) {
    %c0_i32 = arith.constant 0 : i32
    %c0_i32_0 = arith.constant 0 : i32
    return %arg0, %c0_i32 : i32, i32
  }
  func.func @transform_1(%arg0: i32, %arg1: i32) -> (i32, i32) {
    %c0_i32 = arith.constant 0 : i32
    %c0_i32_0 = arith.constant 0 : i32
    %c0_i32_1 = arith.constant 0 : i32
    return %c0_i32, %c0_i32_0 : i32, i32
  }
  func.func @transform_2(%arg0: i32, %arg1: i32) -> (i32, i32) {
    %c0_i32 = arith.constant 0 : i32
    %c0_i32_0 = arith.constant 0 : i32
    return %c0_i32, %arg1 : i32, i32
  }
  func.func @transform_3(%arg0: i32, %arg1: i32) -> (i32, i32) {
    %c0_i32 = arith.constant 0 : i32
    return %arg0, %arg1 : i32, i32
  }
}

module attributes {stable_mosaic.version = 11 : i64} {
  func.func @_attention_kernel(%arg0: i32, %arg1: memref<1x8x192xbf16, #tpu.memory_space<vmem>>, %arg2: memref<8x8xf32, #tpu.memory_space<vmem>>, %arg3: memref<8x8xf32, #tpu.memory_space<vmem>>, %arg4: memref<1x8x64xbf16, #tpu.memory_space<vmem>>) attributes {dimension_semantics = [#tpu.dimension_semantics<parallel>], iteration_bounds = array<i64: 2>, scalar_prefetch = 0 : i64, scratch_operands = 0 : i64, tpu.core_type = #tpu.core_type<tc>, window_params = [{transform_indices = @transform_0, window_bounds = array<i64: 1, 8, 192>}, {pipeline_mode = #tpu.pipeline_mode<synchronous>, transform_indices = @transform_1, window_bounds = array<i64: 8, 8>}, {pipeline_mode = #tpu.pipeline_mode<synchronous>, transform_indices = @transform_2, window_bounds = array<i64: 8, 8>}, {transform_indices = @transform_3, window_bounds = array<i64: 1, 8, 64>}]} {
    %c0 = arith.constant 0 : index
    %c0_0 = arith.constant 0 : index
    %0 = vector.load %arg2[%c0, %c0_0] : memref<8x8xf32, #tpu.memory_space<vmem>>, vector<8x8xf32>
    %c0_1 = arith.constant 0 : index
    %c0_2 = arith.constant 0 : index
    %1 = vector.load %arg3[%c0_1, %c0_2] : memref<8x8xf32, #tpu.memory_space<vmem>>, vector<8x8xf32>
    %c0_3 = arith.constant 0 : index
    %c0_4 = arith.constant 0 : index
    %c0_5 = arith.constant 0 : index
    %2 = vector.load %arg1[%c0_3, %c0_4, %c0_5] : memref<1x8x192xbf16, #tpu.memory_space<vmem>>, vector<1x8x8xbf16>
    %3 = vector.shape_cast %2 : vector<1x8x8xbf16> to vector<8x8xbf16>
    %4 = arith.extf %3 : vector<8x8xbf16> to vector<8x8xf32>
    %cst = arith.constant 2.500000e-01 : f32
    %5 = vector.broadcast %cst : f32 to vector<8x8xf32>
    %6 = arith.mulf %4, %5 : vector<8x8xf32>
    %c0_6 = arith.constant 0 : index
    %c0_7 = arith.constant 0 : index
    %c8 = arith.constant 8 : index
    %7 = vector.load %arg1[%c0_6, %c0_7, %c8] : memref<1x8x192xbf16, #tpu.memory_space<vmem>>, vector<1x8x8xbf16>
    %8 = vector.shape_cast %7 : vector<1x8x8xbf16> to vector<8x8xbf16>
    %9 = arith.extf %8 : vector<8x8xbf16> to vector<8x8xf32>
    %cst_8 = arith.constant 2.500000e-01 : f32
    %10 = vector.broadcast %cst_8 : f32 to vector<8x8xf32>
    %11 = arith.mulf %9, %10 : vector<8x8xf32>
    %c0_9 = arith.constant 0 : index
    %c0_10 = arith.constant 0 : index
    %c64 = arith.constant 64 : index
    %12 = vector.load %arg1[%c0_9, %c0_10, %c64] : memref<1x8x192xbf16, #tpu.memory_space<vmem>>, vector<1x8x8xbf16>
    %13 = vector.shape_cast %12 : vector<1x8x8xbf16> to vector<8x8xbf16>
    %14 = arith.extf %13 : vector<8x8xbf16> to vector<8x8xf32>
    %c0_11 = arith.constant 0 : index
    %c0_12 = arith.constant 0 : index
    %c72 = arith.constant 72 : index
    %15 = vector.load %arg1[%c0_11, %c0_12, %c72] : memref<1x8x192xbf16, #tpu.memory_space<vmem>>, vector<1x8x8xbf16>
    %16 = vector.shape_cast %15 : vector<1x8x8xbf16> to vector<8x8xbf16>
    %17 = arith.extf %16 : vector<8x8xbf16> to vector<8x8xf32>
    %c0_13 = arith.constant 0 : index
    %c0_14 = arith.constant 0 : index
    %c128 = arith.constant 128 : index
    %18 = vector.load %arg1[%c0_13, %c0_14, %c128] : memref<1x8x192xbf16, #tpu.memory_space<vmem>>, vector<1x8x16xbf16>
    %19 = vector.shape_cast %18 : vector<1x8x16xbf16> to vector<8x16xbf16>
    %20 = arith.mulf %6, %0 : vector<8x8xf32>
    %21 = arith.mulf %11, %1 : vector<8x8xf32>
    %22 = arith.subf %20, %21 : vector<8x8xf32>
    %23 = arith.mulf %11, %0 : vector<8x8xf32>
    %24 = arith.mulf %6, %1 : vector<8x8xf32>
    %25 = arith.addf %23, %24 : vector<8x8xf32>
    %26 = arith.mulf %14, %0 : vector<8x8xf32>
    %27 = arith.mulf %17, %1 : vector<8x8xf32>
    %28 = arith.subf %26, %27 : vector<8x8xf32>
    %29 = arith.mulf %17, %0 : vector<8x8xf32>
    %30 = arith.mulf %14, %1 : vector<8x8xf32>
    %31 = arith.addf %29, %30 : vector<8x8xf32>
    %cst_15 = arith.constant dense<0.000000e+00> : vector<8x8xf32>
    %32 = tpu.matmul %22, %28, %cst_15 {dimension_numbers = #tpu.dot_dimension_numbers<[1], [1], [0], [0], [0, 0, 1, 0], [], []>} : vector<8x8xf32>, vector<8x8xf32>, vector<8x8xf32> -> vector<8x8xf32>
    %cst_16 = arith.constant dense<0.000000e+00> : vector<8x8xf32>
    %33 = tpu.matmul %25, %31, %cst_16 {dimension_numbers = #tpu.dot_dimension_numbers<[1], [1], [0], [0], [0, 0, 1, 0], [], []>} : vector<8x8xf32>, vector<8x8xf32>, vector<8x8xf32> -> vector<8x8xf32>
    %34 = arith.addf %32, %33 : vector<8x8xf32>
    %cst_17 = arith.constant dense<0xFF800000> : vector<8xf32>
    %35 = vector.multi_reduction <maximumf>, %34, %cst_17 [1] : vector<8x8xf32> to vector<8xf32>
    %36 = vector.shape_cast %35 : vector<8xf32> to vector<8x1xf32>
    %37 = vector.broadcast %36 : vector<8x1xf32> to vector<8x8xf32>
    %38 = arith.subf %34, %37 : vector<8x8xf32>
    %39 = math.exp %38 : vector<8x8xf32>
    %cst_18 = arith.constant dense<0.000000e+00> : vector<8xf32>
    %40 = vector.multi_reduction <add>, %39, %cst_18 [1] : vector<8x8xf32> to vector<8xf32>
    %41 = vector.shape_cast %40 : vector<8xf32> to vector<8x1xf32>
    %42 = tpu.reciprocal %41 {approx = true} : vector<8x1xf32> -> vector<8x1xf32>
    %43 = vector.broadcast %42 : vector<8x1xf32> to vector<8x8xf32>
    %44 = arith.mulf %39, %43 : vector<8x8xf32>
    %45 = arith.truncf %44 : vector<8x8xf32> to vector<8x8xbf16>
    %cst_19 = arith.constant dense<0.000000e+00> : vector<8x16xf32>
    %46 = tpu.matmul %45, %19, %cst_19 {dimension_numbers = #tpu.dot_dimension_numbers<[1], [0], [0], [1], [0, 0, 1, 1], [], []>} : vector<8x8xbf16>, vector<8x16xbf16>, vector<8x16xf32> -> vector<8x16xf32>
    %47 = arith.truncf %46 : vector<8x16xf32> to vector<8x16xbf16>
    %c0_20 = arith.constant 0 : index
    %c0_21 = arith.constant 0 : index
    %c0_22 = arith.constant 0 : index
    %48 = vector.load %arg4[%c0_20, %c0_21, %c0_22] : memref<1x8x64xbf16, #tpu.memory_space<vmem>>, vector<1x8x16xbf16>
    %49 = vector.shape_cast %48 : vector<1x8x16xbf16> to vector<8x16xbf16>
    %50 = vector.shape_cast %47 : vector<8x16xbf16> to vector<1x8x16xbf16>
    tpu.vector_store %arg4[%c0_20, %c0_21, %c0_22], %50 {strides = array<i32>} : memref<1x8x64xbf16, #tpu.memory_space<vmem>>, vector<1x8x16xbf16>,
    %c0_23 = arith.constant 0 : index
    %c0_24 = arith.constant 0 : index
    %c16 = arith.constant 16 : index
    %51 = vector.load %arg1[%c0_23, %c0_24, %c16] : memref<1x8x192xbf16, #tpu.memory_space<vmem>>, vector<1x8x8xbf16>
    %52 = vector.shape_cast %51 : vector<1x8x8xbf16> to vector<8x8xbf16>
    %53 = arith.extf %52 : vector<8x8xbf16> to vector<8x8xf32>
    %cst_25 = arith.constant 2.500000e-01 : f32
    %54 = vector.broadcast %cst_25 : f32 to vector<8x8xf32>
    %55 = arith.mulf %53, %54 : vector<8x8xf32>
    %c0_26 = arith.constant 0 : index
    %c0_27 = arith.constant 0 : index
    %c24 = arith.constant 24 : index
    %56 = vector.load %arg1[%c0_26, %c0_27, %c24] : memref<1x8x192xbf16, #tpu.memory_space<vmem>>, vector<1x8x8xbf16>
    %57 = vector.shape_cast %56 : vector<1x8x8xbf16> to vector<8x8xbf16>
    %58 = arith.extf %57 : vector<8x8xbf16> to vector<8x8xf32>
    %cst_28 = arith.constant 2.500000e-01 : f32
    %59 = vector.broadcast %cst_28 : f32 to vector<8x8xf32>
    %60 = arith.mulf %58, %59 : vector<8x8xf32>
    %c0_29 = arith.constant 0 : index
    %c0_30 = arith.constant 0 : index
    %c80 = arith.constant 80 : index
    %61 = vector.load %arg1[%c0_29, %c0_30, %c80] : memref<1x8x192xbf16, #tpu.memory_space<vmem>>, vector<1x8x8xbf16>
    %62 = vector.shape_cast %61 : vector<1x8x8xbf16> to vector<8x8xbf16>
    %63 = arith.extf %62 : vector<8x8xbf16> to vector<8x8xf32>
    %c0_31 = arith.constant 0 : index
    %c0_32 = arith.constant 0 : index
    %c88 = arith.constant 88 : index
    %64 = vector.load %arg1[%c0_31, %c0_32, %c88] : memref<1x8x192xbf16, #tpu.memory_space<vmem>>, vector<1x8x8xbf16>
    %65 = vector.shape_cast %64 : vector<1x8x8xbf16> to vector<8x8xbf16>
    %66 = arith.extf %65 : vector<8x8xbf16> to vector<8x8xf32>
    %c0_33 = arith.constant 0 : index
    %c0_34 = arith.constant 0 : index
    %c144 = arith.constant 144 : index
    %67 = vector.load %arg1[%c0_33, %c0_34, %c144] : memref<1x8x192xbf16, #tpu.memory_space<vmem>>, vector<1x8x16xbf16>
    %68 = vector.shape_cast %67 : vector<1x8x16xbf16> to vector<8x16xbf16>
    %69 = arith.mulf %55, %0 : vector<8x8xf32>
    %70 = arith.mulf %60, %1 : vector<8x8xf32>
    %71 = arith.subf %69, %70 : vector<8x8xf32>
    %72 = arith.mulf %60, %0 : vector<8x8xf32>
    %73 = arith.mulf %55, %1 : vector<8x8xf32>
    %74 = arith.addf %72, %73 : vector<8x8xf32>
    %75 = arith.mulf %63, %0 : vector<8x8xf32>
    %76 = arith.mulf %66, %1 : vector<8x8xf32>
    %77 = arith.subf %75, %76 : vector<8x8xf32>
    %78 = arith.mulf %66, %0 : vector<8x8xf32>
    %79 = arith.mulf %63, %1 : vector<8x8xf32>
    %80 = arith.addf %78, %79 : vector<8x8xf32>
    %cst_35 = arith.constant dense<0.000000e+00> : vector<8x8xf32>
    %81 = tpu.matmul %71, %77, %cst_35 {dimension_numbers = #tpu.dot_dimension_numbers<[1], [1], [0], [0], [0, 0, 1, 0], [], []>} : vector<8x8xf32>, vector<8x8xf32>, vector<8x8xf32> -> vector<8x8xf32>
    %cst_36 = arith.constant dense<0.000000e+00> : vector<8x8xf32>
    %82 = tpu.matmul %74, %80, %cst_36 {dimension_numbers = #tpu.dot_dimension_numbers<[1], [1], [0], [0], [0, 0, 1, 0], [], []>} : vector<8x8xf32>, vector<8x8xf32>, vector<8x8xf32> -> vector<8x8xf32>
    %83 = arith.addf %81, %82 : vector<8x8xf32>
    %cst_37 = arith.constant dense<0xFF800000> : vector<8xf32>
    %84 = vector.multi_reduction <maximumf>, %83, %cst_37 [1] : vector<8x8xf32> to vector<8xf32>
    %85 = vector.shape_cast %84 : vector<8xf32> to vector<8x1xf32>
    %86 = vector.broadcast %85 : vector<8x1xf32> to vector<8x8xf32>
    %87 = arith.subf %83, %86 : vector<8x8xf32>
    %88 = math.exp %87 : vector<8x8xf32>
    %cst_38 = arith.constant dense<0.000000e+00> : vector<8xf32>
    %89 = vector.multi_reduction <add>, %88, %cst_38 [1] : vector<8x8xf32> to vector<8xf32>
    %90 = vector.shape_cast %89 : vector<8xf32> to vector<8x1xf32>
    %91 = tpu.reciprocal %90 {approx = true} : vector<8x1xf32> -> vector<8x1xf32>
    %92 = vector.broadcast %91 : vector<8x1xf32> to vector<8x8xf32>
    %93 = arith.mulf %88, %92 : vector<8x8xf32>
    %94 = arith.truncf %93 : vector<8x8xf32> to vector<8x8xbf16>
    %cst_39 = arith.constant dense<0.000000e+00> : vector<8x16xf32>
    %95 = tpu.matmul %94, %68, %cst_39 {dimension_numbers = #tpu.dot_dimension_numbers<[1], [0], [0], [1], [0, 0, 1, 1], [], []>} : vector<8x8xbf16>, vector<8x16xbf16>, vector<8x16xf32> -> vector<8x16xf32>
    %96 = arith.truncf %95 : vector<8x16xf32> to vector<8x16xbf16>
    %c0_40 = arith.constant 0 : index
    %c0_41 = arith.constant 0 : index
    %c16_42 = arith.constant 16 : index
    %97 = vector.load %arg4[%c0_40, %c0_41, %c16_42] : memref<1x8x64xbf16, #tpu.memory_space<vmem>>, vector<1x8x16xbf16>
    %98 = vector.shape_cast %97 : vector<1x8x16xbf16> to vector<8x16xbf16>
    %99 = vector.shape_cast %96 : vector<8x16xbf16> to vector<1x8x16xbf16>
    tpu.vector_store %arg4[%c0_40, %c0_41, %c16_42], %99 {strides = array<i32>} : memref<1x8x64xbf16, #tpu.memory_space<vmem>>, vector<1x8x16xbf16>,
    %c0_43 = arith.constant 0 : index
    %c0_44 = arith.constant 0 : index
    %c32 = arith.constant 32 : index
    %100 = vector.load %arg1[%c0_43, %c0_44, %c32] : memref<1x8x192xbf16, #tpu.memory_space<vmem>>, vector<1x8x8xbf16>
    %101 = vector.shape_cast %100 : vector<1x8x8xbf16> to vector<8x8xbf16>
    %102 = arith.extf %101 : vector<8x8xbf16> to vector<8x8xf32>
    %cst_45 = arith.constant 2.500000e-01 : f32
    %103 = vector.broadcast %cst_45 : f32 to vector<8x8xf32>
    %104 = arith.mulf %102, %103 : vector<8x8xf32>
    %c0_46 = arith.constant 0 : index
    %c0_47 = arith.constant 0 : index
    %c40 = arith.constant 40 : index
    %105 = vector.load %arg1[%c0_46, %c0_47, %c40] : memref<1x8x192xbf16, #tpu.memory_space<vmem>>, vector<1x8x8xbf16>
    %106 = vector.shape_cast %105 : vector<1x8x8xbf16> to vector<8x8xbf16>
    %107 = arith.extf %106 : vector<8x8xbf16> to vector<8x8xf32>
    %cst_48 = arith.constant 2.500000e-01 : f32
    %108 = vector.broadcast %cst_48 : f32 to vector<8x8xf32>
    %109 = arith.mulf %107, %108 : vector<8x8xf32>
    %c0_49 = arith.constant 0 : index
    %c0_50 = arith.constant 0 : index
    %c96 = arith.constant 96 : index
    %110 = vector.load %arg1[%c0_49, %c0_50, %c96] : memref<1x8x192xbf16, #tpu.memory_space<vmem>>, vector<1x8x8xbf16>
    %111 = vector.shape_cast %110 : vector<1x8x8xbf16> to vector<8x8xbf16>
    %112 = arith.extf %111 : vector<8x8xbf16> to vector<8x8xf32>
    %c0_51 = arith.constant 0 : index
    %c0_52 = arith.constant 0 : index
    %c104 = arith.constant 104 : index
    %113 = vector.load %arg1[%c0_51, %c0_52, %c104] : memref<1x8x192xbf16, #tpu.memory_space<vmem>>, vector<1x8x8xbf16>
    %114 = vector.shape_cast %113 : vector<1x8x8xbf16> to vector<8x8xbf16>
    %115 = arith.extf %114 : vector<8x8xbf16> to vector<8x8xf32>
    %c0_53 = arith.constant 0 : index
    %c0_54 = arith.constant 0 : index
    %c160 = arith.constant 160 : index
    %116 = vector.load %arg1[%c0_53, %c0_54, %c160] : memref<1x8x192xbf16, #tpu.memory_space<vmem>>, vector<1x8x16xbf16>
    %117 = vector.shape_cast %116 : vector<1x8x16xbf16> to vector<8x16xbf16>
    %118 = arith.mulf %104, %0 : vector<8x8xf32>
    %119 = arith.mulf %109, %1 : vector<8x8xf32>
    %120 = arith.subf %118, %119 : vector<8x8xf32>
    %121 = arith.mulf %109, %0 : vector<8x8xf32>
    %122 = arith.mulf %104, %1 : vector<8x8xf32>
    %123 = arith.addf %121, %122 : vector<8x8xf32>
    %124 = arith.mulf %112, %0 : vector<8x8xf32>
    %125 = arith.mulf %115, %1 : vector<8x8xf32>
    %126 = arith.subf %124, %125 : vector<8x8xf32>
    %127 = arith.mulf %115, %0 : vector<8x8xf32>
    %128 = arith.mulf %112, %1 : vector<8x8xf32>
    %129 = arith.addf %127, %128 : vector<8x8xf32>
    %cst_55 = arith.constant dense<0.000000e+00> : vector<8x8xf32>
    %130 = tpu.matmul %120, %126, %cst_55 {dimension_numbers = #tpu.dot_dimension_numbers<[1], [1], [0], [0], [0, 0, 1, 0], [], []>} : vector<8x8xf32>, vector<8x8xf32>, vector<8x8xf32> -> vector<8x8xf32>
    %cst_56 = arith.constant dense<0.000000e+00> : vector<8x8xf32>
    %131 = tpu.matmul %123, %129, %cst_56 {dimension_numbers = #tpu.dot_dimension_numbers<[1], [1], [0], [0], [0, 0, 1, 0], [], []>} : vector<8x8xf32>, vector<8x8xf32>, vector<8x8xf32> -> vector<8x8xf32>
    %132 = arith.addf %130, %131 : vector<8x8xf32>
    %cst_57 = arith.constant dense<0xFF800000> : vector<8xf32>
    %133 = vector.multi_reduction <maximumf>, %132, %cst_57 [1] : vector<8x8xf32> to vector<8xf32>
    %134 = vector.shape_cast %133 : vector<8xf32> to vector<8x1xf32>
    %135 = vector.broadcast %134 : vector<8x1xf32> to vector<8x8xf32>
    %136 = arith.subf %132, %135 : vector<8x8xf32>
    %137 = math.exp %136 : vector<8x8xf32>
    %cst_58 = arith.constant dense<0.000000e+00> : vector<8xf32>
    %138 = vector.multi_reduction <add>, %137, %cst_58 [1] : vector<8x8xf32> to vector<8xf32>
    %139 = vector.shape_cast %138 : vector<8xf32> to vector<8x1xf32>
    %140 = tpu.reciprocal %139 {approx = true} : vector<8x1xf32> -> vector<8x1xf32>
    %141 = vector.broadcast %140 : vector<8x1xf32> to vector<8x8xf32>
    %142 = arith.mulf %137, %141 : vector<8x8xf32>
    %143 = arith.truncf %142 : vector<8x8xf32> to vector<8x8xbf16>
    %cst_59 = arith.constant dense<0.000000e+00> : vector<8x16xf32>
    %144 = tpu.matmul %143, %117, %cst_59 {dimension_numbers = #tpu.dot_dimension_numbers<[1], [0], [0], [1], [0, 0, 1, 1], [], []>} : vector<8x8xbf16>, vector<8x16xbf16>, vector<8x16xf32> -> vector<8x16xf32>
    %145 = arith.truncf %144 : vector<8x16xf32> to vector<8x16xbf16>
    %c0_60 = arith.constant 0 : index
    %c0_61 = arith.constant 0 : index
    %c32_62 = arith.constant 32 : index
    %146 = vector.load %arg4[%c0_60, %c0_61, %c32_62] : memref<1x8x64xbf16, #tpu.memory_space<vmem>>, vector<1x8x16xbf16>
    %147 = vector.shape_cast %146 : vector<1x8x16xbf16> to vector<8x16xbf16>
    %148 = vector.shape_cast %145 : vector<8x16xbf16> to vector<1x8x16xbf16>
    tpu.vector_store %arg4[%c0_60, %c0_61, %c32_62], %148 {strides = array<i32>} : memref<1x8x64xbf16, #tpu.memory_space<vmem>>, vector<1x8x16xbf16>,
    %c0_63 = arith.constant 0 : index
    %c0_64 = arith.constant 0 : index
    %c48 = arith.constant 48 : index
    %149 = vector.load %arg1[%c0_63, %c0_64, %c48] : memref<1x8x192xbf16, #tpu.memory_space<vmem>>, vector<1x8x8xbf16>
    %150 = vector.shape_cast %149 : vector<1x8x8xbf16> to vector<8x8xbf16>
    %151 = arith.extf %150 : vector<8x8xbf16> to vector<8x8xf32>
    %cst_65 = arith.constant 2.500000e-01 : f32
    %152 = vector.broadcast %cst_65 : f32 to vector<8x8xf32>
    %153 = arith.mulf %151, %152 : vector<8x8xf32>
    %c0_66 = arith.constant 0 : index
    %c0_67 = arith.constant 0 : index
    %c56 = arith.constant 56 : index
    %154 = vector.load %arg1[%c0_66, %c0_67, %c56] : memref<1x8x192xbf16, #tpu.memory_space<vmem>>, vector<1x8x8xbf16>
    %155 = vector.shape_cast %154 : vector<1x8x8xbf16> to vector<8x8xbf16>
    %156 = arith.extf %155 : vector<8x8xbf16> to vector<8x8xf32>
    %cst_68 = arith.constant 2.500000e-01 : f32
    %157 = vector.broadcast %cst_68 : f32 to vector<8x8xf32>
    %158 = arith.mulf %156, %157 : vector<8x8xf32>
    %c0_69 = arith.constant 0 : index
    %c0_70 = arith.constant 0 : index
    %c112 = arith.constant 112 : index
    %159 = vector.load %arg1[%c0_69, %c0_70, %c112] : memref<1x8x192xbf16, #tpu.memory_space<vmem>>, vector<1x8x8xbf16>
    %160 = vector.shape_cast %159 : vector<1x8x8xbf16> to vector<8x8xbf16>
    %161 = arith.extf %160 : vector<8x8xbf16> to vector<8x8xf32>
    %c0_71 = arith.constant 0 : index
    %c0_72 = arith.constant 0 : index
    %c120 = arith.constant 120 : index
    %162 = vector.load %arg1[%c0_71, %c0_72, %c120] : memref<1x8x192xbf16, #tpu.memory_space<vmem>>, vector<1x8x8xbf16>
    %163 = vector.shape_cast %162 : vector<1x8x8xbf16> to vector<8x8xbf16>
    %164 = arith.extf %163 : vector<8x8xbf16> to vector<8x8xf32>
    %c0_73 = arith.constant 0 : index
    %c0_74 = arith.constant 0 : index
    %c176 = arith.constant 176 : index
    %165 = vector.load %arg1[%c0_73, %c0_74, %c176] : memref<1x8x192xbf16, #tpu.memory_space<vmem>>, vector<1x8x16xbf16>
    %166 = vector.shape_cast %165 : vector<1x8x16xbf16> to vector<8x16xbf16>
    %167 = arith.mulf %153, %0 : vector<8x8xf32>
    %168 = arith.mulf %158, %1 : vector<8x8xf32>
    %169 = arith.subf %167, %168 : vector<8x8xf32>
    %170 = arith.mulf %158, %0 : vector<8x8xf32>
    %171 = arith.mulf %153, %1 : vector<8x8xf32>
    %172 = arith.addf %170, %171 : vector<8x8xf32>
    %173 = arith.mulf %161, %0 : vector<8x8xf32>
    %174 = arith.mulf %164, %1 : vector<8x8xf32>
    %175 = arith.subf %173, %174 : vector<8x8xf32>
    %176 = arith.mulf %164, %0 : vector<8x8xf32>
    %177 = arith.mulf %161, %1 : vector<8x8xf32>
    %178 = arith.addf %176, %177 : vector<8x8xf32>
    %cst_75 = arith.constant dense<0.000000e+00> : vector<8x8xf32>
    %179 = tpu.matmul %169, %175, %cst_75 {dimension_numbers = #tpu.dot_dimension_numbers<[1], [1], [0], [0], [0, 0, 1, 0], [], []>} : vector<8x8xf32>, vector<8x8xf32>, vector<8x8xf32> -> vector<8x8xf32>
    %cst_76 = arith.constant dense<0.000000e+00> : vector<8x8xf32>
    %180 = tpu.matmul %172, %178, %cst_76 {dimension_numbers = #tpu.dot_dimension_numbers<[1], [1], [0], [0], [0, 0, 1, 0], [], []>} : vector<8x8xf32>, vector<8x8xf32>, vector<8x8xf32> -> vector<8x8xf32>
    %181 = arith.addf %179, %180 : vector<8x8xf32>
    %cst_77 = arith.constant dense<0xFF800000> : vector<8xf32>
    %182 = vector.multi_reduction <maximumf>, %181, %cst_77 [1] : vector<8x8xf32> to vector<8xf32>
    %183 = vector.shape_cast %182 : vector<8xf32> to vector<8x1xf32>
    %184 = vector.broadcast %183 : vector<8x1xf32> to vector<8x8xf32>
    %185 = arith.subf %181, %184 : vector<8x8xf32>
    %186 = math.exp %185 : vector<8x8xf32>
    %cst_78 = arith.constant dense<0.000000e+00> : vector<8xf32>
    %187 = vector.multi_reduction <add>, %186, %cst_78 [1] : vector<8x8xf32> to vector<8xf32>
    %188 = vector.shape_cast %187 : vector<8xf32> to vector<8x1xf32>
    %189 = tpu.reciprocal %188 {approx = true} : vector<8x1xf32> -> vector<8x1xf32>
    %190 = vector.broadcast %189 : vector<8x1xf32> to vector<8x8xf32>
    %191 = arith.mulf %186, %190 : vector<8x8xf32>
    %192 = arith.truncf %191 : vector<8x8xf32> to vector<8x8xbf16>
    %cst_79 = arith.constant dense<0.000000e+00> : vector<8x16xf32>
    %193 = tpu.matmul %192, %166, %cst_79 {dimension_numbers = #tpu.dot_dimension_numbers<[1], [0], [0], [1], [0, 0, 1, 1], [], []>} : vector<8x8xbf16>, vector<8x16xbf16>, vector<8x16xf32> -> vector<8x16xf32>
    %194 = arith.truncf %193 : vector<8x16xf32> to vector<8x16xbf16>
    %c0_80 = arith.constant 0 : index
    %c0_81 = arith.constant 0 : index
    %c48_82 = arith.constant 48 : index
    %195 = vector.load %arg4[%c0_80, %c0_81, %c48_82] : memref<1x8x64xbf16, #tpu.memory_space<vmem>>, vector<1x8x16xbf16>
    %196 = vector.shape_cast %195 : vector<1x8x16xbf16> to vector<8x16xbf16>
    %197 = vector.shape_cast %194 : vector<8x16xbf16> to vector<1x8x16xbf16>
    tpu.vector_store %arg4[%c0_80, %c0_81, %c48_82], %197 {strides = array<i32>} : memref<1x8x64xbf16, #tpu.memory_space<vmem>>, vector<1x8x16xbf16>,
    return
  }
  func.func @transform_0(%arg0: i32) -> (i32, i32, i32) {
    %c0_i32 = arith.constant 0 : i32
    %c0_i32_0 = arith.constant 0 : i32
    %c0_i32_1 = arith.constant 0 : i32
    return %arg0, %c0_i32, %c0_i32_0 : i32, i32, i32
  }
  func.func @transform_1(%arg0: i32) -> (i32, i32) {
    %c0_i32 = arith.constant 0 : i32
    %c0_i32_0 = arith.constant 0 : i32
    %c0_i32_1 = arith.constant 0 : i32
    return %c0_i32, %c0_i32_0 : i32, i32
  }
  func.func @transform_2(%arg0: i32) -> (i32, i32) {
    %c0_i32 = arith.constant 0 : i32
    %c0_i32_0 = arith.constant 0 : i32
    %c0_i32_1 = arith.constant 0 : i32
    return %c0_i32, %c0_i32_0 : i32, i32
  }
  func.func @transform_3(%arg0: i32) -> (i32, i32, i32) {
    %c0_i32 = arith.constant 0 : i32
    %c0_i32_0 = arith.constant 0 : i32
    %c0_i32_1 = arith.constant 0 : i32
    return %arg0, %c0_i32, %c0_i32_0 : i32, i32, i32
  }
}

module attributes {stable_mosaic.version = 11 : i64} {
  func.func @_norm_matmul_kernel(%arg0: i32, %arg1: i32, %arg2: memref<16x64xbf16, #tpu.memory_space<vmem>>, %arg3: memref<1x64xbf16, #tpu.memory_space<vmem>>, %arg4: memref<64x128xbf16, #tpu.memory_space<vmem>>, %arg5: memref<16x128xf32, #tpu.memory_space<vmem>>) attributes {dimension_semantics = [#tpu.dimension_semantics<parallel>, #tpu.dimension_semantics<parallel>], iteration_bounds = array<i64: 1, 1>, scalar_prefetch = 0 : i64, scratch_operands = 0 : i64, tpu.core_type = #tpu.core_type<tc>, window_params = [{transform_indices = @transform_0, window_bounds = array<i64: 16, 64>}, {pipeline_mode = #tpu.pipeline_mode<synchronous>, transform_indices = @transform_1, window_bounds = array<i64: 1, 64>}, {transform_indices = @transform_2, window_bounds = array<i64: 64, 128>}, {transform_indices = @transform_3, window_bounds = array<i64: 16, 128>}]} {
    %c0 = arith.constant 0 : index
    %c0_0 = arith.constant 0 : index
    %0 = vector.load %arg2[%c0, %c0_0] : memref<16x64xbf16, #tpu.memory_space<vmem>>, vector<16x64xbf16>
    %1 = arith.extf %0 : vector<16x64xbf16> to vector<16x64xf32>
    %2 = arith.mulf %1, %1 : vector<16x64xf32>
    %cst = arith.constant dense<0.000000e+00> : vector<16xf32>
    %3 = vector.multi_reduction <add>, %2, %cst [1] : vector<16x64xf32> to vector<16xf32>
    %4 = vector.shape_cast %3 : vector<16xf32> to vector<16x1xf32>
    %cst_1 = arith.constant 6.400000e+01 : f32
    %5 = vector.broadcast %cst_1 : f32 to vector<16x1xf32>
    %6 = arith.divf %4, %5 : vector<16x1xf32>
    %cst_2 = arith.constant 9.99999974E-6 : f32
    %7 = vector.broadcast %cst_2 : f32 to vector<16x1xf32>
    %8 = arith.addf %6, %7 : vector<16x1xf32>
    %9 = math.rsqrt %8 : vector<16x1xf32>
    %10 = vector.broadcast %9 : vector<16x1xf32> to vector<16x64xf32>
    %11 = arith.mulf %1, %10 : vector<16x64xf32>
    %c0_3 = arith.constant 0 : index
    %c0_4 = arith.constant 0 : index
    %12 = vector.load %arg3[%c0_3, %c0_4] : memref<1x64xbf16, #tpu.memory_space<vmem>>, vector<1x64xbf16>
    %13 = arith.extf %12 : vector<1x64xbf16> to vector<1x64xf32>
    %14 = vector.broadcast %13 : vector<1x64xf32> to vector<16x64xf32>
    %15 = arith.mulf %11, %14 : vector<16x64xf32>
    %16 = arith.truncf %15 : vector<16x64xf32> to vector<16x64xbf16>
    %c0_5 = arith.constant 0 : index
    %c0_6 = arith.constant 0 : index
    %17 = vector.load %arg4[%c0_5, %c0_6] : memref<64x128xbf16, #tpu.memory_space<vmem>>, vector<64x128xbf16>
    %cst_7 = arith.constant dense<0.000000e+00> : vector<16x128xf32>
    %18 = tpu.matmul %16, %17, %cst_7 {dimension_numbers = #tpu.dot_dimension_numbers<[1], [0], [0], [1], [0, 0, 1, 1], [], []>} : vector<16x64xbf16>, vector<64x128xbf16>, vector<16x128xf32> -> vector<16x128xf32>
    %c0_8 = arith.constant 0 : index
    %c0_9 = arith.constant 0 : index
    %19 = vector.load %arg5[%c0_8, %c0_9] : memref<16x128xf32, #tpu.memory_space<vmem>>, vector<16x128xf32>
    tpu.vector_store %arg5[%c0_8, %c0_9], %18 {strides = array<i32>} : memref<16x128xf32, #tpu.memory_space<vmem>>, vector<16x128xf32>,
    return
  }
  func.func @transform_0(%arg0: i32, %arg1: i32) -> (i32, i32) {
    %c0_i32 = arith.constant 0 : i32
    %c0_i32_0 = arith.constant 0 : i32
    return %arg0, %c0_i32 : i32, i32
  }
  func.func @transform_1(%arg0: i32, %arg1: i32) -> (i32, i32) {
    %c0_i32 = arith.constant 0 : i32
    %c0_i32_0 = arith.constant 0 : i32
    %c0_i32_1 = arith.constant 0 : i32
    return %c0_i32, %c0_i32_0 : i32, i32
  }
  func.func @transform_2(%arg0: i32, %arg1: i32) -> (i32, i32) {
    %c0_i32 = arith.constant 0 : i32
    %c0_i32_0 = arith.constant 0 : i32
    return %c0_i32, %arg1 : i32, i32
  }
  func.func @transform_3(%arg0: i32, %arg1: i32) -> (i32, i32) {
    %c0_i32 = arith.constant 0 : i32
    return %arg0, %arg1 : i32, i32
  }
}

module attributes {stable_mosaic.version = 11 : i64} {
  func.func @_matmul_residual_kernel(%arg0: i32, %arg1: i32, %arg2: memref<16x64xbf16, #tpu.memory_space<vmem>>, %arg3: memref<64x64xbf16, #tpu.memory_space<vmem>>, %arg4: memref<16x64xbf16, #tpu.memory_space<vmem>>, %arg5: memref<16x64xbf16, #tpu.memory_space<vmem>>) attributes {dimension_semantics = [#tpu.dimension_semantics<parallel>, #tpu.dimension_semantics<parallel>], iteration_bounds = array<i64: 1, 1>, scalar_prefetch = 0 : i64, scratch_operands = 0 : i64, tpu.core_type = #tpu.core_type<tc>, window_params = [{transform_indices = @transform_0, window_bounds = array<i64: 16, 64>}, {transform_indices = @transform_1, window_bounds = array<i64: 64, 64>}, {transform_indices = @transform_2, window_bounds = array<i64: 16, 64>}, {transform_indices = @transform_3, window_bounds = array<i64: 16, 64>}]} {
    %c0 = arith.constant 0 : index
    %c0_0 = arith.constant 0 : index
    %0 = vector.load %arg2[%c0, %c0_0] : memref<16x64xbf16, #tpu.memory_space<vmem>>, vector<16x64xbf16>
    %c0_1 = arith.constant 0 : index
    %c0_2 = arith.constant 0 : index
    %1 = vector.load %arg3[%c0_1, %c0_2] : memref<64x64xbf16, #tpu.memory_space<vmem>>, vector<64x64xbf16>
    %cst = arith.constant dense<0.000000e+00> : vector<16x64xf32>
    %2 = tpu.matmul %0, %1, %cst {dimension_numbers = #tpu.dot_dimension_numbers<[1], [0], [0], [1], [0, 0, 1, 1], [], []>} : vector<16x64xbf16>, vector<64x64xbf16>, vector<16x64xf32> -> vector<16x64xf32>
    %c0_3 = arith.constant 0 : index
    %c0_4 = arith.constant 0 : index
    %3 = vector.load %arg4[%c0_3, %c0_4] : memref<16x64xbf16, #tpu.memory_space<vmem>>, vector<16x64xbf16>
    %4 = arith.extf %3 : vector<16x64xbf16> to vector<16x64xf32>
    %5 = arith.addf %2, %4 : vector<16x64xf32>
    %6 = arith.truncf %5 : vector<16x64xf32> to vector<16x64xbf16>
    %c0_5 = arith.constant 0 : index
    %c0_6 = arith.constant 0 : index
    %7 = vector.load %arg5[%c0_5, %c0_6] : memref<16x64xbf16, #tpu.memory_space<vmem>>, vector<16x64xbf16>
    tpu.vector_store %arg5[%c0_5, %c0_6], %6 {strides = array<i32>} : memref<16x64xbf16, #tpu.memory_space<vmem>>, vector<16x64xbf16>,
    return
  }
  func.func @transform_0(%arg0: i32, %arg1: i32) -> (i32, i32) {
    %c0_i32 = arith.constant 0 : i32
    %c0_i32_0 = arith.constant 0 : i32
    return %arg0, %c0_i32 : i32, i32
  }
  func.func @transform_1(%arg0: i32, %arg1: i32) -> (i32, i32) {
    %c0_i32 = arith.constant 0 : i32
    %c0_i32_0 = arith.constant 0 : i32
    return %c0_i32, %arg1 : i32, i32
  }
  func.func @transform_2(%arg0: i32, %arg1: i32) -> (i32, i32) {
    %c0_i32 = arith.constant 0 : i32
    return %arg0, %arg1 : i32, i32
  }
  func.func @transform_3(%arg0: i32, %arg1: i32) -> (i32, i32) {
    %c0_i32 = arith.constant 0 : i32
    return %arg0, %arg1 : i32, i32
  }
}

</mosaic_0001>

<bundles_post_ra>
// kernel: transformer_forward.11
= control target key start
LH: loop header
LB: loop body
LE: loop exit
PB: predicated region body
PF: predicated region fallthrough
CT: control target
= control target key end

     0   :  { %8 = vsyncpa [#allocation3], 0  ;;  %s196_s12 = smov [#allocation2]   ;;  %s236_s0 = inlined_call_operand.vmem [shape: bf16[16,64], index: 0, kind: input, shape index: {}]   ;;  %s237_s1 = inlined_call_operand.hbm [shape: bf16[64,64], index: 1, kind: input, shape index: {}]   ;;  %s238_s2 = inlined_call_operand.vmem [shape: bf16[16,64], index: 2, kind: input, shape index: {}]   ;;  %s239_s3 = inlined_call_operand.vmem [shape: bf16[16,64], index: 3, kind: output, shape index: {}]  }
   0x1   :  { %s16_s13 = sshll.u32 %s196_s12, 4  ;;  %s17_s13 = int_to_ptr.vmem [resolvable:$true] %s16_s13 }
   0x2   :  { %s182_s14 = scalar_lea.vmem %s17_s13, 512  ;;  %p187_p1 = scmp.lt.s32.totalorder %s17_s13, %s17_s13 }
   0x3   :  { %p183_p0 = scmp.ne.s32.totalorder %s17_s13, %s182_s14  ;;  %p188_p2 = scmp.lt.s32.totalorder %s182_s14, %s182_s14 }
   0x5   :  { %p189_p3 = por %p188_p2, %p187_p1 }
   0x7   :  { %p190_p4 = pnand %p189_p3, %p183_p0 }
   0x9   :  { %193 = shalt.err (!%p190_p4)
}
   0xa   :  { %s197_s15 = smov 64   ;;  %s198_s16 = smov 4  }
   0xb   :  { %22 = dma.hbm_to_vmem [thread:$0]  %s237_s1, 512, %s17_s13, [#allocation3], %s197_s15, %s197_s15, %s198_s16  }
   0xc   :  { %194 = dma.done.wait [#allocation3], 512  }
   0xd   :  { %195 = vsyncadd [#allocation3], 4294966784  ;;  %v199_v0 = vmov 0.0   ;;  %vm200_vm0 = vmmov 0   ;;  %v169_v1 = vld [vmem:[#allocation2 + $0x18] sm:$0xff]   ;;  %v170_v2 = vld [vmem:[#allocation2 + $0x10] sm:$0xff]  }
   0xe   :  { %152 = vmatprep.subr.bf16.mxu0 %v199_v0  ;;  %160 = vmatprep.mubr.msk.bf16.mxu0 %vm200_vm0, %v199_v0  ;;  %v171_v3 = vld [vmem:[#allocation2 + $0x8] sm:$0xff]   ;;  %v172_v4 = vld [vmem:[#allocation2] sm:$0xff]   ;;  %vm72_vm1 = vcmask 523264   ;;  %vm125_vm2 = vcmask 519168  }
   0xf   :  { %153 = vmatpush3.bf16.msra.mxu0 %v169_v1  ;;  %v173_v5 = vld [vmem:[%s236_s0] sm:$0xff]  }
  0x10   :  { %154 = vmatprep.subr.bf16.mxu0 %v199_v0  ;;  %v144_v6 = vld [vmem:[%s238_s2] sm:$0xff]  }
  0x11   :  { %v145_v7 = vunpack.c.l.bf16 %v144_v6  ;;  %v146_v10 = vunpack.c.h.bf16 %v144_v6 }
  0x13   :  { %155 = vmatpush3.bf16.msra.mxu0 %v170_v2 }
  0x14   :  { %156 = vmatprep.subr.bf16.mxu0 %v199_v0 }
  0x17   :  { %157 = vmatpush3.bf16.msra.mxu0 %v171_v3 }
  0x18   :  { %158 = vmatprep.subr.bf16.mxu0 %v199_v0 }
  0x1b   :  { %159 = vmatpush3.bf16.msra.mxu0 %v172_v4 }
  0x1e   :  { %161 = vmatmul.mubr.msk.bf16.vlgmr.msra.gmra.mxu0 %vm72_vm1, %v173_v5 }
  0xde   :  { %v110_v8 = vpop.f32.mrf.mxu0 }
  0xdf   :  { %v111_v9 = vadd.f32 %v145_v7, %v110_v8 }
  0xe0   :  { %v162_v11 = vpop.f32.mrf.mxu0 }
  0xe1   :  { %v141_v12 = vpack.c.bf16 %v111_v9, %v111_v9 }
  0xe2   :  { %v113_v13 = vpop.f32.mrf.mxu0 }
  0xe3   :  { %126 = vst.msk [vmem:[%s239_s3] sm:$0xf] %vm125_vm2, %v141_v12  ;;  %v114_v14 = vadd.f32 %v146_v10, %v113_v13 }
  0xe4   :  { %v163_v15 = vpop.f32.mrf.mxu0 }
  0xe5   :  { %v142_v16 = vpack.c.bf16 %v114_v14, %v114_v14 }
  0xe7   :  { %127 = vst.msk [vmem:[%s239_s3 + $0x4] sm:$0xf] %vm125_vm2, %v142_v16 }
  0xe8   :  { %132 = vsyncpa [#allocation3], 1 }

// kernel: transformer_forward.9
= control target key start
LH: loop header
LB: loop body
LE: loop exit
PB: predicated region body
PF: predicated region fallthrough
CT: control target
= control target key end

     0   :  { %vm21_vm0 = vcmask 523264   ;;  %v195_v8 = vmov 0   ;;  %v39_v22 = vlaneseq  ;;  %vm152_vm1 = vcmask 1043456   ;;  %s255_s0 = inlined_call_operand.vmem [shape: bf16[16,64], index: 0, kind: input, shape index: {}]   ;;  %s256_s2 = inlined_call_operand.vmem [shape: bf16[64,192], index: 2, kind: input, shape index: {}]   ;;  %s257_s1 = inlined_call_operand.vmem [shape: bf16[1,64], index: 1, kind: input, shape index: {}]   ;;  %s258_s3 = inlined_call_operand.vmem [shape: bf16[16,192], index: 3, kind: output, shape index: {}]  }
   0x1   :  { %v175_v0 = vld [vmem:[%s255_s0] sm:$0xff]   ;;  %v179_v7 = vld [vmem:[%s256_s2 + $0x34] ss:$8 sps:$4 sm:$0xff]   ;;  %129 = vmatprep.mubr.bf16.mxu0 %v195_v8  ;;  %v181_v9 = vld [vmem:[%s256_s2 + $0x30] ss:$8 sps:$4 sm:$0xff]   ;;  %vm153_vm2 = vcmask 523268  }
   0x2   :  { %v176_v1 = vunpack.c.l.bf16 %v175_v0  ;;  %v177_v2 = vunpack.c.h.bf16 %v175_v0  ;;  %105 = vmatprep.subr.bf16.mxu0 %v179_v7  ;;  %v182_v10 = vld [vmem:[%s256_s2 + $0x24] ss:$8 sps:$4 sm:$0xff]   ;;  %v184_v11 = vld [vmem:[%s256_s2 + $0x20] ss:$8 sps:$4 sm:$0xff]   ;;  %v185_v12 = vld [vmem:[%s256_s2 + $0x14] ss:$8 sps:$4 sm:$0xff]  }
   0x3   :  { %106 = vmatpush1.bf16.msra.mxu0 %v181_v9  ;;  %v187_v13 = vld [vmem:[%s256_s2 + $0x10] ss:$8 sps:$4 sm:$0xff]   ;;  %v188_v14 = vld [vmem:[%s256_s2 + $0x4] ss:$8 sps:$4 sm:$0xff]   ;;  %v190_v15 = vld [vmem:[%s256_s2] ss:$8 sps:$4 sm:$0xff]  }
   0x4   :  { %v19_v3 = vmul.f32 %v176_v1, %v176_v1  ;;  %v20_v4 = vmul.f32 %v177_v2, %v177_v2  ;;  %107 = vmatprep.subr.bf16.mxu0 %v182_v10  ;;  %v40_v23 = vshrl.u32 %v39_v22, 7  ;;  %v37_v24 = vld [vmem:[%s257_s1] sm:$0x1]  ;;  %vm154_vm3 = vmor %vm153_vm2, %vm152_vm1 }
   0x5   :  { %v38_v25 = vunpack.c.l.bf16 %v37_v24 }
   0x6   :  { %v22_v5 = vsel %vm21_vm0, %v19_v3, 0.0  ;;  %v25_v6 = vsel %vm21_vm0, %v20_v4, 0.0  ;;  %v41_v26 = vsub.s32 0, %v40_v23 }
   0x7   :  { %23 = vadd.xlane.f32.xlu0 %v22_v5  ;;  %108 = vmatpush1.bf16.msra.mxu0 %v184_v11 }
   0x8   :  { %109 = vmatprep.subr.bf16.mxu0 %v185_v12  ;;  %v42_v29 = vrot.slane %v38_v25, %v41_v26 }
   0xb   :  { %26 = vadd.xlane.f32.xlu0 %v25_v6  ;;  %110 = vmatpush1.bf16.msra.mxu0 %v187_v13 }
   0xc   :  { %111 = vmatprep.subr.bf16.mxu0 %v188_v14 }
   0xf   :  { %112 = vmatpush1.bf16.msra.mxu0 %v190_v15 }
  0x90   :  { %v24_v16 = vpop.xlane.xlu0 %23 }
  0x91   :  { %v29_v17 = vmul.f32 0.015625, %v24_v16 }
  0x93   :  { %v31_v18 = vadd.f32 1e-05, %v29_v17 }
  0x94   :  { %v27_v19 = vpop.xlane.xlu0 %26 }
  0x95   :  { %191 = vrsqrt.f32 %v31_v18  ;;  %v30_v20 = vmul.f32 0.015625, %v27_v19 }
  0x97   :  { %v32_v21 = vadd.f32 1e-05, %v30_v20 }
  0x99   :  { %193 = vrsqrt.f32 %v32_v21 }
  0xa2   :  { %v192_v27 = vpop.eup %191 }
  0xa3   :  { %v35_v28 = vmul.f32 %v192_v27, %v176_v1 }
  0xa5   :  { %v43_v32 = vmul.f32 %v42_v29, %v35_v28 }
  0xa6   :  { %v194_v30 = vpop.eup %193 }
  0xa7   :  { %v36_v31 = vmul.f32 %v194_v30, %v177_v2 }
  0xa9   :  { %v44_v33 = vmul.f32 %v42_v29, %v36_v31 }
  0xab   :  { %v45_v34 = vpack.c.bf16 %v44_v33, %v43_v32 }
  0xad   :  { %169 = vmatmul.mubr.msk.bf16.vlgmr.msra.gmra.mxu0 %vm21_vm0, %v45_v34 }
 0x16d   :  { %v131_v35 = vpop.f32.mrf.mxu0 }
 0x16f   :  { %v133_v36 = vpop.f32.mrf.mxu0 }
 0x170   :  { %v172_v37 = vpack.c.bf16 %v133_v36, %v131_v35 }
 0x171   :  { %v135_v38 = vpop.f32.mrf.mxu0 }
 0x172   :  { %155 = vst.msk [vmem:[%s258_s3] sm:$0xff] %vm154_vm3, %v172_v37 }
 0x173   :  { %v137_v39 = vpop.f32.mrf.mxu0 }
 0x174   :  { %v173_v40 = vpack.c.bf16 %v137_v39, %v135_v38 }
 0x176   :  { %156 = vst.msk [vmem:[%s258_s3 + $0x8] sm:$0xff] %vm154_vm3, %v173_v40 }

// kernel: transformer_forward.12
= control target key start
LH: loop header
LB: loop body
LE: loop exit
PB: predicated region body
PF: predicated region fallthrough
CT: control target
= control target key end

     0   :  { %vm31_vm0 = vcmask 523264   ;;  %v567_v15 = vmov 0   ;;  %v49_v22 = vlaneseq  ;;  %vm63_vm1 = vcmask 519168   ;;  %s721_s0 = inlined_call_operand.vmem [shape: bf16[16,64], index: 0, kind: input, shape index: {}]   ;;  %s722_s2 = inlined_call_operand.vmem [shape: bf16[64,192], index: 2, kind: input, shape index: {}]   ;;  %s723_s3 = inlined_call_operand.vmem [shape: bf16[64,192], index: 3, kind: input, shape index: {}]   ;;  %s724_s4 = inlined_call_operand.vmem [shape: bf16[192,64], index: 4, kind: input, shape index: {}]   ;;  %s725_s1 = inlined_call_operand.vmem [shape: bf16[1,64], index: 1, kind: input, shape index: {}]   ;;  %s726_s5 = inlined_call_operand.vmem [shape: bf16[16,64], index: 5, kind: output, shape index: {}]  }
   0x1   :  { %v506_v0 = vld [vmem:[%s721_s0] sm:$0xff]   ;;  %v510_v7 = vld [vmem:[%s722_s2 + $0x34] ss:$8 sps:$4 sm:$0xff]   ;;  %v512_v8 = vld [vmem:[%s722_s2 + $0x30] ss:$8 sps:$4 sm:$0xff]   ;;  %159 = vmatprep.mubr.bf16.mxu1 %v567_v15  ;;  %396 = vmatprep.subr.bf16.mxu0 %v567_v15 }
   0x2   :  { %v507_v1 = vunpack.c.l.bf16 %v506_v0  ;;  %v508_v2 = vunpack.c.h.bf16 %v506_v0  ;;  %135 = vmatprep.subr.bf16.mxu1 %v510_v7  ;;  %v513_v9 = vld [vmem:[%s722_s2 + $0x24] ss:$8 sps:$4 sm:$0xff]   ;;  %v515_v10 = vld [vmem:[%s722_s2 + $0x20] ss:$8 sps:$4 sm:$0xff]   ;;  %v516_v11 = vld [vmem:[%s722_s2 + $0x14] ss:$8 sps:$4 sm:$0xff]  }
   0x3   :  { %136 = vmatpush1.bf16.msra.mxu1 %v512_v8  ;;  %v518_v12 = vld [vmem:[%s722_s2 + $0x10] ss:$8 sps:$4 sm:$0xff]   ;;  %v519_v13 = vld [vmem:[%s722_s2 + $0x4] ss:$8 sps:$4 sm:$0xff]   ;;  %v521_v14 = vld [vmem:[%s722_s2] ss:$8 sps:$4 sm:$0xff]  }
   0x4   :  { %v29_v3 = vmul.f32 %v507_v1, %v507_v1  ;;  %66 = vst.msk [vmem:[#allocation2] sm:$0xff] %vm31_vm0, %v507_v1  ;;  %v30_v4 = vmul.f32 %v508_v2, %v508_v2  ;;  %67 = vst.msk [vmem:[#allocation2 + $0x8] sm:$0xff] %vm31_vm0, %v508_v2  ;;  %137 = vmatprep.subr.bf16.mxu1 %v513_v9  ;;  %v524_v16 = vld [vmem:[%s723_s3 + $0x34] ss:$8 sps:$4 sm:$0xff]   ;;  %v50_v25 = vshrl.u32 %v49_v22, 7  ;;  %v537_v47 = vld [vmem:[%s724_s4 + $0x28] sm:$0xff]  }
   0x5   :  { %v535_v17 = vld [vmem:[%s724_s4 + $0x38] sm:$0xff]   ;;  %v47_v26 = vld [vmem:[%s725_s1] sm:$0x1]  ;;  %v528_v40 = vld [vmem:[%s723_s3 + $0x24] ss:$8 sps:$4 sm:$0xff]  }
   0x6   :  { %v32_v5 = vsel %vm31_vm0, %v29_v3, 0.0  ;;  %v35_v6 = vsel %vm31_vm0, %v30_v4, 0.0  ;;  %397 = vmatpush1.bf16.msra.mxu0 %v535_v17  ;;  %v48_v27 = vunpack.c.l.bf16 %v47_v26  ;;  %v51_v28 = vsub.s32 0, %v50_v25  ;;  %v522_v38 = vld [vmem:[%s723_s3 + $0x30] ss:$8 sps:$4 sm:$0xff]   ;;  %v538_v48 = vld [vmem:[%s724_s4 + $0x20] sm:$0xff]  }
   0x7   :  { %33 = vadd.xlane.f32.xlu0 %v32_v5  ;;  %138 = vmatpush1.bf16.msra.mxu1 %v515_v10  ;;  %v526_v41 = vld [vmem:[%s723_s3 + $0x20] ss:$8 sps:$4 sm:$0xff]   ;;  %v531_v42 = vld [vmem:[%s723_s3 + $0x14] ss:$8 sps:$4 sm:$0xff]   ;;  %v529_v43 = vld [vmem:[%s723_s3 + $0x10] ss:$8 sps:$4 sm:$0xff]  }
   0x8   :  { %139 = vmatprep.subr.bf16.mxu1 %v516_v11  ;;  %398 = vmatprep.subr.bf16.mxu0 %v567_v15  ;;  %v52_v29 = vrot.slane %v48_v27, %v51_v28  ;;  %v534_v44 = vld [vmem:[%s723_s3 + $0x4] ss:$8 sps:$4 sm:$0xff]   ;;  %v532_v45 = vld [vmem:[%s723_s3] ss:$8 sps:$4 sm:$0xff]   ;;  %v536_v46 = vld [vmem:[%s724_s4 + $0x30] sm:$0xff]  }
   0x9   :  { %v539_v49 = vld [vmem:[%s724_s4 + $0x18] sm:$0xff]   ;;  %v540_v50 = vld [vmem:[%s724_s4 + $0x10] sm:$0xff]   ;;  %v541_v51 = vld [vmem:[%s724_s4 + $0x8] sm:$0xff]  }
   0xa   :  { %399 = vmatpush1.bf16.msra.mxu0 %v536_v46  ;;  %v542_v52 = vld [vmem:[%s724_s4] sm:$0xff]   ;;  %v543_v53 = vld [vmem:[%s724_s4 + $0x58] sm:$0xff]   ;;  %v544_v54 = vld [vmem:[%s724_s4 + $0x50] sm:$0xff]  }
   0xb   :  { %36 = vadd.xlane.f32.xlu0 %v35_v6  ;;  %140 = vmatpush1.bf16.msra.mxu1 %v518_v12  ;;  %v545_v55 = vld [vmem:[%s724_s4 + $0x48] sm:$0xff]   ;;  %v546_v56 = vld [vmem:[%s724_s4 + $0x40] sm:$0xff]  }
   0xc   :  { %141 = vmatprep.subr.bf16.mxu1 %v519_v13  ;;  %400 = vmatprep.subr.bf16.mxu0 %v567_v15  ;;  %v293_v27 = vld [vmem:[#allocation2] sm:$0xff] }
   0xe   :  { %401 = vmatpush1.bf16.msra.mxu0 %v537_v47 }
   0xf   :  { %142 = vmatpush1.bf16.msra.mxu1 %v521_v14  ;;  %402 = vmatprep.subr.bf16.mxu0 %v567_v15 }
  0x10   :  { %226 = vmatprep.subr.bf16.mxu1 %v524_v16 }
  0x12   :  { %403 = vmatpush1.bf16.msra.mxu0 %v538_v48 }
  0x13   :  { %404 = vmatprep.subr.bf16.mxu0 %v567_v15 }
  0x16   :  { %405 = vmatpush1.bf16.msra.mxu0 %v539_v49 }
  0x17   :  { %406 = vmatprep.subr.bf16.mxu0 %v567_v15 }
  0x1a   :  { %407 = vmatpush1.bf16.msra.mxu0 %v540_v50 }
  0x1b   :  { %408 = vmatprep.subr.bf16.mxu0 %v567_v15 }
  0x1e   :  { %409 = vmatpush1.bf16.msra.mxu0 %v541_v51 }
  0x1f   :  { %410 = vmatprep.subr.bf16.mxu0 %v567_v15 }
  0x22   :  { %411 = vmatpush1.bf16.msra.mxu0 %v542_v52 }
  0x23   :  { %420 = vmatprep.subr.bf16.mxu0 %v567_v15 }
  0x26   :  { %421 = vmatpush2.bf16.msra.mxu0 %v543_v53 }
  0x27   :  { %422 = vmatprep.subr.bf16.mxu0 %v567_v15 }
  0x2a   :  { %423 = vmatpush2.bf16.msra.mxu0 %v544_v54 }
  0x2b   :  { %424 = vmatprep.subr.bf16.mxu0 %v567_v15 }
  0x2e   :  { %425 = vmatpush2.bf16.msra.mxu0 %v545_v55 }
  0x2f   :  { %426 = vmatprep.subr.bf16.mxu0 %v567_v15 }
  0x32   :  { %427 = vmatpush2.bf16.msra.mxu0 %v546_v56 }
  0x90   :  { %v34_v18 = vpop.xlane.xlu0 %33 }
  0x91   :  { %v39_v19 = vmul.f32 0.015625, %v34_v18 }
  0x93   :  { %v41_v20 = vadd.f32 1e-05, %v39_v19 }
  0x94   :  { %v37_v21 = vpop.xlane.xlu0 %36 }
  0x95   :  { %547 = vrsqrt.f32 %v41_v20  ;;  %v40_v23 = vmul.f32 0.015625, %v37_v21 }
  0x97   :  { %v42_v24 = vadd.f32 1e-05, %v40_v23 }
  0x99   :  { %549 = vrsqrt.f32 %v42_v24 }
  0xa2   :  { %v548_v30 = vpop.eup %547 }
  0xa3   :  { %v45_v31 = vmul.f32 %v548_v30, %v507_v1 }
  0xa5   :  { %v53_v32 = vmul.f32 %v52_v29, %v45_v31  ;;  %v294_v31 = vld [vmem:[#allocation2 + $0x8] sm:$0xff] }
  0xa6   :  { %v550_v33 = vpop.eup %549 }
  0xa7   :  { %v501_v34 = vpack.c.bf16 %v53_v32, %v53_v32  ;;  %v46_v35 = vmul.f32 %v550_v33, %v508_v2 }
  0xa9   :  { %64 = vst.msk [vmem:[#allocation3] sm:$0xf] %vm63_vm1, %v501_v34  ;;  %v54_v36 = vmul.f32 %v52_v29, %v46_v35 }
  0xab   :  { %v502_v37 = vpack.c.bf16 %v54_v36, %v54_v36 }
  0xad   :  { %65 = vst.msk [vmem:[#allocation3 + $0x4] sm:$0xf] %vm63_vm1, %v502_v37 }
  0xb4   :  { %v525_v39 = vld [vmem:[#allocation3] sm:$0xff]  }
  0xb5   :  { %472 = vmatmul.mubr.msk.bf16.vlgmr.msra.gmra.mxu1 %vm31_vm0, %v525_v39 }
  0xb6   :  { %227 = vmatpush1.bf16.msra.mxu1 %v522_v38  ;;  %250 = vmatprep.mubr.bf16.mxu1 %v567_v15 }
  0xb7   :  { %228 = vmatprep.subr.bf16.mxu1 %v528_v40 }
  0xba   :  { %229 = vmatpush1.bf16.msra.mxu1 %v526_v41 }
  0xbb   :  { %230 = vmatprep.subr.bf16.mxu1 %v531_v42 }
  0xbe   :  { %231 = vmatpush1.bf16.msra.mxu1 %v529_v43 }
  0xbf   :  { %232 = vmatprep.subr.bf16.mxu1 %v534_v44 }
  0xc2   :  { %233 = vmatpush1.bf16.msra.mxu1 %v532_v45 }
  0xc5   :  { %481 = vmatmul.mubr.msk.bf16.vlgmr.msra.gmra.mxu1 %vm31_vm0, %v525_v39 }
 0x175   :  { %v161_v57 = vpop.f32.mrf.mxu1 }
 0x176   :  { %v482_v58 = vmul.f32 -1.442695, %v161_v57 }
 0x177   :  { %v163_v59 = vpop.f32.mrf.mxu1 }
 0x178   :  { %551 = vpow2.f32 %v482_v58  ;;  %v483_v60 = vmul.f32 -1.442695, %v163_v59 }
 0x179   :  { %v165_v61 = vpop.f32.mrf.mxu1 }
 0x17a   :  { %553 = vpow2.f32 %v483_v60  ;;  %v484_v62 = vmul.f32 -1.442695, %v165_v61 }
 0x17b   :  { %v167_v63 = vpop.f32.mrf.mxu1 }
 0x17c   :  { %555 = vpow2.f32 %v484_v62  ;;  %v485_v0 = vmul.f32 -1.442695, %v167_v63 }
 0x17e   :  { %557 = vpow2.f32 %v485_v0 }
 0x185   :  { %v552_v1 = vpop.eup %551  ;;  %v252_v9 = vpop.f32.mrf.mxu1 }
 0x186   :  { %v273_v3 = vadd.f32 1.0, %v552_v1 }
 0x187   :  { %v554_v2 = vpop.eup %553  ;;  %v254_v10 = vpop.f32.mrf.mxu1 }
 0x188   :  { %v274_v4 = vadd.f32 1.0, %v554_v2 }
 0x189   :  { %v556_v5 = vpop.eup %555  ;;  %v256_v14 = vpop.f32.mrf.mxu1 }
 0x18a   :  { %559 = vrcp.f32 %v274_v4  ;;  %v275_v6 = vadd.f32 1.0, %v556_v5 }
 0x18b   :  { %v558_v7 = vpop.eup %557  ;;  %561 = vrcp.f32 %v273_v3  ;;  %v258_v21 = vpop.f32.mrf.mxu1 }
 0x18c   :  { %563 = vrcp.f32 %v275_v6  ;;  %v276_v8 = vadd.f32 1.0, %v558_v7 }
 0x18e   :  { %565 = vrcp.f32 %v276_v8 }
 0x197   :  { %v560_v11 = vpop.eup %559 }
 0x198   :  { %v562_v12 = vpop.eup %561  ;;  %v286_v15 = vmul.f32 %v560_v11, %v163_v59 }
 0x199   :  { %v564_v13 = vpop.eup %563  ;;  %v285_v18 = vmul.f32 %v562_v12, %v161_v57 }
 0x19a   :  { %v287_v16 = vmul.f32 %v564_v13, %v165_v61  ;;  %v290_v22 = vmul.f32 %v286_v15, %v254_v10 }
 0x19b   :  { %v566_v17 = vpop.eup %565  ;;  %v289_v24 = vmul.f32 %v285_v18, %v252_v9 }
 0x19c   :  { %v288_v19 = vmul.f32 %v566_v17, %v167_v63  ;;  %v291_v20 = vmul.f32 %v287_v16, %v256_v14 }
 0x19e   :  { %v292_v23 = vmul.f32 %v288_v19, %v258_v21  ;;  %v295_v26 = vpack.c.bf16 %v291_v20, %v289_v24 }
 0x1a0   :  { %v296_v25 = vpack.c.bf16 %v292_v23, %v290_v22 }
 0x1a2   :  { %498 = vmatprep.mubr.msk.bf16.mxu0 %vm31_vm0, %v296_v25 }
 0x1a3   :  { %429 = vmatmul.mubr.bf16.vlgmr.msra.gmra.mxu0 %v295_v26 }
 0x263   :  { %v430_v28 = vpop.f32.mrf.mxu0 }
 0x264   :  { %v437_v29 = vadd.f32 %v430_v28, %v293_v27 }
 0x265   :  { %v432_v30 = vpop.f32.mrf.mxu0 }
 0x266   :  { %439 = vst.msk [vmem:[#allocation2] sm:$0xff] %vm31_vm0, %v437_v29 }
 0x267   :  { %v433_v32 = vpop.f32.mrf.mxu0 }
 0x268   :  { %v438_v33 = vadd.f32 %v433_v32, %v294_v31 }
 0x269   :  { %v435_v34 = vpop.f32.mrf.mxu0 }
 0x26a   :  { %440 = vst.msk [vmem:[#allocation2 + $0x8] sm:$0xff] %vm31_vm0, %v438_v33 }
 0x26d   :  { %v444_v35 = vld [vmem:[#allocation2] sm:$0xff] }
 0x26e   :  { %v503_v36 = vpack.c.bf16 %v444_v35, %v444_v35 }
 0x270   :  { %455 = vst.msk [vmem:[%s726_s5] sm:$0xf] %vm63_vm1, %v503_v36 }
 0x271   :  { %v445_v37 = vld [vmem:[#allocation2 + $0x8] sm:$0xff] }
 0x272   :  { %v504_v38 = vpack.c.bf16 %v445_v37, %v445_v37 }
 0x274   :  { %456 = vst.msk [vmem:[%s726_s5 + $0x4] sm:$0xf] %vm63_vm1, %v504_v38 }

// kernel: transformer_forward.10
= control target key start
LH: loop header
LB: loop body
LE: loop exit
PB: predicated region body
PF: predicated region fallthrough
CT: control target
= control target key end

     0   :  { %s1579_s12 = smov 0   ;;  %s1827_s0 = inlined_call_operand.vmem [shape: bf16[2,8,192], index: 0, kind: input, shape index: {}]   ;;  %s1828_s1 = inlined_call_operand.vmem [shape: f32[8,8], index: 1, kind: input, shape index: {}]   ;;  %s1829_s2 = inlined_call_operand.vmem [shape: f32[8,8], index: 2, kind: input, shape index: {}]   ;;  %s1830_s3 = inlined_call_operand.vmem [shape: bf16[2,8,64], index: 3, kind: output, shape index: {}]  }
   0x1 LB: > { %s1362_s13 = sadd.s32 4294967295, %s1540_s12   ;;  %p1366_p0 = scmp.ge.s32.totalorder %s1540_s12, 1  ;;  %s1540_s12 = sphi %s1579_s12, %s13_s12  }
   0x2   : > { %p137_p1 = scmp.lt.s32.totalorder %s1540_s12, 3 }
   0x4   : > { %p138_p2 = pnand %p1366_p0, %p137_p1 }
   0x5   : > { %s1542_s16 = smov (!%p138_p2), 80   ;;  %s1543_s17 = smov (!%p138_p2), 64  }
   0x6   : > { %141 = sbr.rel (%p138_p2) target bundleno = 1250 (0x4e2), region = 32  ;;  %s1544_s18 = smov (!%p138_p2), 72  }
   0x7   : > { %s1545_s19 = smov (!%p138_p2), 16   ;;  %p160_p3 = scmp.lt.s32.totalorder (!%p138_p2), %s1362_s13, 1 }
   0x8   : > { %s1546_s20 = smov (!%p138_p2), 88   ;;  %s1547_s21 = smov (!%p138_p2), 24  }
   0x9   : > { %s1548_s23 = smov (!%p138_p2), 96   ;;  %s1549_s24 = smov (!%p138_p2), 32  }
   0xa   : > { %s1550_s28 = smov (!%p138_p2), 104   ;;  %s1551_s29 = smov (!%p138_p2), 40  }
   0xb   : > { %v171_v0 = vld [vmem:[%s1829_s2] sm:$0xff]  ;;  %s1832_s13 = smov (!%p160_p3, %s1362_s13), 1  ;;  %s1552_s30 = smov 112   ;;  %v1557_v45 = vmov 0.0   ;;  %vm1558_vm0 = vmmov 0   ;;  %vm230_vm1 = vcmask 64512  }
   0xc   : > { %492 = vrot.lane.b32.xlu1 %v171_v0, %s1542_s16  ;;  %215 = vrot.lane.b32.xlu0 %v171_v0, %s1543_s17  ;;  %s1398_s22 = sshll.u32 %s1832_s13, 3  ;;  %s1553_s4 = smov 48   ;;  %v1618_v3 = vld [vmem:[%s1828_s1] sm:$0xff]  ;;  %vm398_vm2 = vcmask 1043456   ;;  %vm443_vm3 = vcmask 125952   ;;  %vm731_vm4 = vcmask 257152  }
   0xd   : > { %s1604_s27 = scalar_lea.vmem %s1827_s0, %s1398_s22  ;;  %s1554_s5 = smov 120   ;;  %1426 = vmatprep.subr.mxu1 %v1557_v45  ;;  %1436 = vmatprep.subr.bf16.mxu0 %v1557_v45  ;;  %vm1019_vm5 = vcmask 388352   ;;  %vm1307_vm6 = vcmask 519552  }
   0xe   : > { %v172_v1 = vld [vmem:[%s1604_s27] sm:$0xf]  ;;  %s1555_s6 = smov 56   ;;  %s1556_s9 = smov 8   ;;  %1428 = vmatprep.mubr.msk.f32.mxu1 %vm1558_vm0, %v1557_v45  ;;  %1438 = vmatprep.mubr.msk.bf16.mxu0 %vm1558_vm0, %v1557_v45 }
   0xf   : > { %v1613_v2 = vunpack.c.l.bf16 %v172_v1  ;;  %v445_v6 = vld [vmem:[%s1604_s27] sm:$0xf]  ;;  %s1369_s10 = sshll.u32 %s1832_s13, 2 }
  0x10   : > { %202 = vrot.lane.b32.xlu0 %v171_v0, %s1544_s18  ;;  %466 = vrot.lane.b32.xlu1 %v171_v0, %s1545_s19  ;;  %v1653_v7 = vunpack.c.l.bf16 %v445_v6  ;;  %v733_v15 = vld [vmem:[%s1604_s27] sm:$0xf]  ;;  %s1815_s15 = scalar_lea.vmem %s1830_s3, %s1369_s10 }
  0x11   : > { %v1623_v4 = vmul.f32 0.25, %v1613_v2  ;;  %v1666_v20 = vunpack.c.l.bf16 %v733_v15  ;;  %v1021_v25 = vld [vmem:[%s1604_s27] sm:$0xf] }
  0x12   : > { %v1663_v16 = vmul.f32 0.25, %v1653_v7  ;;  %v1681_v31 = vunpack.c.l.bf16 %v1021_v25 }
  0x13   : > { %v192_v5 = vmul.f32 %v1623_v4, %v171_v0  ;;  %v1678_v27 = vmul.f32 0.25, %v1666_v20 }
  0x14   : > { %479 = vrot.lane.b32.xlu0 %v171_v0, %s1546_s20  ;;  %453 = vrot.lane.b32.xlu1 %v171_v0, %s1547_s21  ;;  %v1691_v37 = vmul.f32 0.25, %v1681_v31 }
  0x18   : > { %780 = vrot.lane.b32.xlu0 %v171_v0, %s1548_s23  ;;  %754 = vrot.lane.b32.xlu1 %v171_v0, %s1549_s24 }
  0x1c   : > { %767 = vrot.lane.b32.xlu0 %v171_v0, %s1550_s28  ;;  %741 = vrot.lane.b32.xlu1 %v171_v0, %s1551_s29 }
  0x20   : > { %1068 = vrot.lane.b32.xlu0 %v171_v0, %s1552_s30  ;;  %1042 = vrot.lane.b32.xlu1 %v171_v0, %s1553_s4 }
  0x24   : > { %1055 = vrot.lane.b32.xlu0 %v171_v0, %s1554_s5  ;;  %1029 = vrot.lane.b32.xlu1 %v171_v0, %s1555_s6 }
  0x28   : > { %211 = vrot.lane.b32.xlu0 %v1618_v3, %s1544_s18  ;;  %198 = vrot.lane.b32.xlu1 %v1618_v3, %s1543_s17 }
  0x2c   : > { %188 = vrot.lane.b32.xlu0 %v1618_v3, %s1556_s9  ;;  %488 = vrot.lane.b32.xlu1 %v1618_v3, %s1546_s20 }
  0x30   : > { %194 = vrot.lane.b32.xlu0 %v192_v5, %s1556_s9  ;;  %462 = vrot.lane.b32.xlu1 %v1618_v3, %s1547_s21 }
  0x34   : > { %178 = vrot.lane.b32.xlu0 %v171_v0, %s1556_s9  ;;  %449 = vrot.lane.b32.xlu1 %v1618_v3, %s1545_s19 }
  0x38   : > { %475 = vrot.lane.b32.xlu0 %v1618_v3, %s1542_s16  ;;  %750 = vrot.lane.b32.xlu1 %v1618_v3, %s1551_s29 }
  0x3c   : > { %776 = vrot.lane.b32.xlu0 %v1618_v3, %s1550_s28  ;;  %737 = vrot.lane.b32.xlu1 %v1618_v3, %s1549_s24 }
  0x40   : > { %763 = vrot.lane.b32.xlu0 %v1618_v3, %s1548_s23 }
  0x44   : > { %1064 = vrot.lane.b32.xlu0 %v1618_v3, %s1554_s5 }
  0x48   : > { %1051 = vrot.lane.b32.xlu0 %v1618_v3, %s1552_s30 }
  0x7e   : > { %v493_v8 = vpop.permute.xlu1 %492  ;;  %v216_v9 = vpop.permute.xlu0 %215 }
  0x7f   : > { %v495_v10 = vmul.f32 %v493_v8, %v1653_v7  ;;  %v218_v11 = vmul.f32 %v216_v9, %v1613_v2 }
  0x81   : > { %220 = vrot.lane.b32.xlu1 %v218_v11, %s1556_s9  ;;  %497 = vrot.lane.b32.xlu0 %v495_v10, %s1556_s9 }
  0x82   : > { %v203_v12 = vpop.permute.xlu0 %202  ;;  %v467_v13 = vpop.permute.xlu1 %466 }
  0x83   : > { %v205_v14 = vmul.f32 %v203_v12, %v1613_v2  ;;  %v469_v21 = vmul.f32 %v467_v13, %v1663_v16 }
  0x85   : > { %207 = vrot.lane.b32.xlu1 %v205_v14, %s1554_s5 }
  0x86   : > { %v480_v17 = vpop.permute.xlu0 %479  ;;  %v454_v18 = vpop.permute.xlu1 %453 }
  0x87   : > { %v482_v19 = vmul.f32 %v480_v17, %v1653_v7  ;;  %v456_v26 = vmul.f32 %v454_v18, %v1663_v16 }
  0x89   : > { %1038 = vrot.lane.b32.xlu1 %v1618_v3, %s1555_s6  ;;  %484 = vrot.lane.b32.xlu0 %v482_v19, %s1554_s5 }
  0x8a   : > { %v781_v22 = vpop.permute.xlu0 %780  ;;  %v755_v23 = vpop.permute.xlu1 %754 }
  0x8b   : > { %v783_v24 = vmul.f32 %v781_v22, %v1666_v20  ;;  %v757_v32 = vmul.f32 %v755_v23, %v1678_v27 }
  0x8d   : > { %471 = vrot.lane.b32.xlu1 %v469_v21, %s1556_s9  ;;  %785 = vrot.lane.b32.xlu0 %v783_v24, %s1556_s9 }
  0x8e   : > { %v768_v28 = vpop.permute.xlu0 %767  ;;  %v742_v29 = vpop.permute.xlu1 %741 }
  0x8f   : > { %v770_v30 = vmul.f32 %v768_v28, %v1666_v20  ;;  %v744_v36 = vmul.f32 %v742_v29, %v1678_v27 }
  0x91   : > { %458 = vrot.lane.b32.xlu1 %v456_v26, %s1554_s5  ;;  %772 = vrot.lane.b32.xlu0 %v770_v30, %s1554_s5 }
  0x92   : > { %v1069_v33 = vpop.permute.xlu0 %1068  ;;  %v1043_v34 = vpop.permute.xlu1 %1042 }
  0x93   : > { %v1071_v35 = vmul.f32 %v1069_v33, %v1681_v31  ;;  %v1045_v41 = vmul.f32 %v1043_v34, %v1691_v37 }
  0x95   : > { %759 = vrot.lane.b32.xlu1 %v757_v32, %s1556_s9  ;;  %1073 = vrot.lane.b32.xlu0 %v1071_v35, %s1556_s9 }
  0x96   : > { %v1056_v38 = vpop.permute.xlu0 %1055  ;;  %v1030_v39 = vpop.permute.xlu1 %1029 }
  0x97   : > { %v1058_v40 = vmul.f32 %v1056_v38, %v1681_v31  ;;  %v1032_v42 = vmul.f32 %v1030_v39, %v1691_v37 }
  0x99   : > { %746 = vrot.lane.b32.xlu1 %v744_v36, %s1554_s5  ;;  %1060 = vrot.lane.b32.xlu0 %v1058_v40, %s1554_s5 }
  0x9a   : > { %v212_v43 = vpop.permute.xlu0 %211  ;;  %v199_v51 = vpop.permute.xlu1 %198 }
  0x9b   : > { %v214_v62 = vmul.f32 %v212_v43, %v1613_v2  ;;  %v201_v1 = vmul.f32 %v199_v51, %v1613_v2 }
  0x9d   : > { %1047 = vrot.lane.b32.xlu1 %v1045_v41, %s1556_s9  ;;  %1034 = vrot.lane.b32.xlu0 %v1032_v42, %s1554_s5 }
  0x9e   : > { %v189_v44 = vpop.permute.xlu0 %188  ;;  %v489_v52 = vpop.permute.xlu1 %488 }
  0x9f   : > { %v191_v46 = vmul.f32 %v189_v44, %v1623_v4  ;;  %v491_v9 = vmul.f32 %v489_v52, %v1653_v7 }
  0xa1   : > { %1025 = vrot.lane.b32.xlu1 %v1618_v3, %s1553_s4 }
  0xa2   : > { %v195_v47 = vpop.permute.xlu0 %194  ;;  %v463_v54 = vpop.permute.xlu1 %462 }
  0xa3   : > { %v197_v48 = vadd.f32 %v195_v47, %v191_v46  ;;  %v465_v14 = vmul.f32 %v463_v54, %v1663_v16 }
  0xa5   : > { %225 = vrot.lane.b32.xlu0 %v197_v48, %s1554_s5  ;;  %v176_v48 = vmul.f32 %v1623_v4, %v1618_v3 }
  0xa6   : > { %v179_v49 = vpop.permute.xlu0 %178  ;;  %v450_v56 = vpop.permute.xlu1 %449 }
  0xa7   : > { %v181_v50 = vmul.f32 %v179_v49, %v1623_v4  ;;  %v452_v21 = vmul.f32 %v450_v56, %v1663_v16 }
  0xa9   : > { %183 = vrot.lane.b32.xlu0 %v181_v50, %s1554_s5 }
  0xaa   : > { %v476_v53 = vpop.permute.xlu0 %475  ;;  %v751_v58 = vpop.permute.xlu1 %750 }
  0xab   : > { %v478_v13 = vmul.f32 %v476_v53, %v1653_v7  ;;  %v753_v26 = vmul.f32 %v751_v58, %v1678_v27 }
  0xae   : > { %v777_v55 = vpop.permute.xlu0 %776  ;;  %v738_v60 = vpop.permute.xlu1 %737 }
  0xaf   : > { %v779_v19 = vmul.f32 %v777_v55, %v1666_v20  ;;  %v740_v33 = vmul.f32 %v738_v60, %v1678_v27 }
  0xb2   : > { %v764_v57 = vpop.permute.xlu0 %763 }
  0xb3   : > { %v766_v25 = vmul.f32 %v764_v57, %v1666_v20 }
  0xb6   : > { %v1065_v59 = vpop.permute.xlu0 %1064 }
  0xb7   : > { %v1067_v32 = vmul.f32 %v1065_v59, %v1681_v31 }
  0xba   : > { %v1052_v61 = vpop.permute.xlu0 %1051 }
  0xbb   : > { %v1054_v38 = vmul.f32 %v1052_v61, %v1681_v31 }
  0xf3   : > { %v221_v63 = vpop.permute.xlu1 %220  ;;  %v498_v5 = vpop.permute.xlu0 %497 }
  0xf4   : > { %v223_v0 = vadd.f32 %v221_v63, %v214_v62  ;;  %v500_v12 = vadd.f32 %v498_v5, %v491_v9 }
  0xf6   : > { %228 = vrot.lane.b32.xlu1 %v223_v0, %s1555_s6 }
  0xf7   : > { %v208_v6 = vpop.permute.xlu1 %207 }
  0xf8   : > { %v210_v8 = vsub.f32 %v201_v1, %v208_v6 }
  0xfa   : > { %306 = vrot.lane.b32.xlu1 %v210_v8, %s1543_s17 }
  0xfb   : > { %v1039_v10 = vpop.permute.xlu1 %1038  ;;  %v485_v11 = vpop.permute.xlu0 %484 }
  0xfc   : > { %v487_v17 = vsub.f32 %v478_v13, %v485_v11  ;;  %v1041_v39 = vmul.f32 %v1039_v10, %v1691_v37 }
  0xfe   : > { %505 = vrot.lane.b32.xlu1 %v500_v12, %s1551_s29 }
  0xff   : > { %v472_v15 = vpop.permute.xlu1 %471  ;;  %v786_v2 = vpop.permute.xlu0 %785 }
 0x100   : > { %v474_v18 = vadd.f32 %v472_v15, %v465_v14  ;;  %v788_v24 = vadd.f32 %v786_v2, %v779_v19 }
 0x102   : > { %585 = vrot.lane.b32.xlu1 %v487_v17, %s1553_s4  ;;  %502 = vrot.lane.b32.xlu0 %v474_v18, %s1550_s28 }
 0x103   : > { %v459_v22 = vpop.permute.xlu1 %458  ;;  %v773_v23 = vpop.permute.xlu0 %772 }
 0x104   : > { %v461_v7 = vsub.f32 %v452_v21, %v459_v22  ;;  %v775_v30 = vsub.f32 %v766_v25, %v773_v23 }
 0x106   : > { %793 = vrot.lane.b32.xlu1 %v788_v24, %s1547_s21  ;;  %582 = vrot.lane.b32.xlu0 %v461_v7, %s1552_s30 }
 0x107   : > { %v760_v28 = vpop.permute.xlu1 %759  ;;  %v1074_v29 = vpop.permute.xlu0 %1073 }
 0x108   : > { %v762_v16 = vadd.f32 %v760_v28, %v753_v26  ;;  %v1076_v20 = vadd.f32 %v1074_v29, %v1067_v32 }
 0x10a   : > { %873 = vrot.lane.b32.xlu1 %v775_v30, %s1549_s24  ;;  %790 = vrot.lane.b32.xlu0 %v762_v16, %s1546_s20 }
 0x10b   : > { %v747_v34 = vpop.permute.xlu1 %746  ;;  %v1061_v36 = vpop.permute.xlu0 %1060 }
 0x10c   : > { %v749_v35 = vsub.f32 %v740_v33, %v747_v34  ;;  %v1063_v41 = vsub.f32 %v1054_v38, %v1061_v36 }
 0x10e   : > { %1081 = vrot.lane.b32.xlu1 %v1076_v20, %s1556_s9  ;;  %870 = vrot.lane.b32.xlu0 %v749_v35, %s1548_s23 }
 0x10f   : > { %v1048_v40 = vpop.permute.xlu1 %1047  ;;  %v1035_v43 = vpop.permute.xlu0 %1034 }
 0x110   : > { %v1050_v42 = vadd.f32 %v1048_v40, %v1041_v39 }
 0x112   : > { %1161 = vrot.lane.b32.xlu1 %v1063_v41, %s1545_s19  ;;  %1078 = vrot.lane.b32.xlu0 %v1050_v42, %s1544_s18  ;;  %v1515_v41 = vld [vmem:[%s1604_s27 + $0x4] ss:$0 sps:$4 sm:$0xff]  }
 0x113   : > { %v1026_v27 = vpop.permute.xlu1 %1025  ;;  %v175_v42 = vld [vmem:[%s1604_s27 + $0x4] sm:$0xf] }
 0x114   : > { %v1028_v44 = vmul.f32 %v1026_v27, %v1691_v37  ;;  %v400_v27 = vsel %vm398_vm2, %v175_v42, 0 }
 0x115   : > { %1437 = vmatpush3.bf16.msra.mxu0 %v400_v27 }
 0x116   : > { %v1037_v46 = vsub.f32 %v1028_v44, %v1035_v43  ;;  %1452 = vmatprep.subr.bf16.mxu0 %v1557_v45  ;;  %v1516_v44 = vld [vmem:[%s1604_s27 + $0x4] ss:$0 sps:$4 sm:$0xff]  }
 0x117   : > { %v226_v31 = vpop.permute.xlu0 %225 }
 0x118   : > { %1158 = vrot.lane.b32.xlu0 %v1037_v46, %s1542_s16 }
 0x11b   : > { %v184_v49 = vpop.permute.xlu0 %183 }
 0x11c   : > { %v186_v37 = vsub.f32 %v176_v48, %v184_v49  ;;  %v1517_v49 = vld [vmem:[%s1604_s27 + $0x4] ss:$0 sps:$4 sm:$0xff]  }
 0x168   : > { %v229_v47 = vpop.permute.xlu1 %228 }
 0x169   : > { %1427 = vmatpush3.xpose.msk.msra.mxu1 %vm230_vm1, %v229_v47 }
 0x16a   : > { %1431 = vmatprep.subr.mxu1 %v1557_v45 }
 0x16c   : > { %v307_v50 = vpop.permute.xlu1 %306  ;;  %1429 = vmatmul.mubr.msk.f32.vlgmr.msra.gmra.mxu1 %vm230_vm1, %v226_v31 }
 0x16d   : > { %1432 = vmatpush3.xpose.msk.msra.mxu1 %vm230_vm1, %v307_v50  ;;  %1433 = vmatprep.mubr.msk.f32.mxu1 %vm1558_vm0, %v1557_v45 }
 0x16e   : > { %1442 = vmatprep.subr.mxu1 %v1557_v45 }
 0x170   : > { %v506_v51 = vpop.permute.xlu1 %505  ;;  %1434 = vmatmul.mubr.msk.f32.vlgmr.msra.gmra.mxu1 %vm230_vm1, %v186_v37 }
 0x171   : > { %1443 = vmatpush3.xpose.msk.msra.mxu1 %vm230_vm1, %v506_v51  ;;  %1444 = vmatprep.mubr.msk.f32.mxu1 %vm1558_vm0, %v1557_v45 }
 0x172   : > { %1447 = vmatprep.subr.mxu1 %v1557_v45 }
 0x174   : > { %v586_v3 = vpop.permute.xlu1 %585  ;;  %v503_v4 = vpop.permute.xlu0 %502 }
 0x175   : > { %1445 = vmatmul.mubr.msk.f32.vlgmr.msra.gmra.mxu1 %vm230_vm1, %v503_v4 }
 0x176   : > { %1448 = vmatpush3.xpose.msk.msra.mxu1 %vm230_vm1, %v586_v3  ;;  %1449 = vmatprep.mubr.msk.f32.mxu1 %vm1558_vm0, %v1557_v45 }
 0x177   : > { %1458 = vmatprep.subr.mxu1 %v1557_v45 }
 0x178   : > { %v794_v52 = vpop.permute.xlu1 %793  ;;  %v583_v53 = vpop.permute.xlu0 %582 }
 0x179   : > { %1450 = vmatmul.mubr.msk.f32.vlgmr.msra.gmra.mxu1 %vm230_vm1, %v583_v53 }
 0x17a   : > { %1459 = vmatpush3.xpose.msk.msra.mxu1 %vm230_vm1, %v794_v52  ;;  %1460 = vmatprep.mubr.msk.f32.mxu1 %vm1558_vm0, %v1557_v45 }
 0x17b   : > { %1463 = vmatprep.subr.mxu1 %v1557_v45 }
 0x17c   : > { %v874_v54 = vpop.permute.xlu1 %873  ;;  %v791_v55 = vpop.permute.xlu0 %790 }
 0x17d   : > { %1461 = vmatmul.mubr.msk.f32.vlgmr.msra.gmra.mxu1 %vm230_vm1, %v791_v55 }
 0x17e   : > { %1464 = vmatpush3.xpose.msk.msra.mxu1 %vm230_vm1, %v874_v54  ;;  %1465 = vmatprep.mubr.msk.f32.mxu1 %vm1558_vm0, %v1557_v45 }
 0x17f   : > { %1474 = vmatprep.subr.mxu1 %v1557_v45 }
 0x180   : > { %v1082_v56 = vpop.permute.xlu1 %1081  ;;  %v871_v57 = vpop.permute.xlu0 %870 }
 0x181   : > { %1466 = vmatmul.mubr.msk.f32.vlgmr.msra.gmra.mxu1 %vm230_vm1, %v871_v57 }
 0x182   : > { %1475 = vmatpush3.xpose.msk.msra.mxu1 %vm230_vm1, %v1082_v56  ;;  %1476 = vmatprep.mubr.msk.f32.mxu1 %vm1558_vm0, %v1557_v45 }
 0x183   : > { %1479 = vmatprep.subr.mxu1 %v1557_v45 }
 0x184   : > { %v1162_v58 = vpop.permute.xlu1 %1161  ;;  %v1079_v59 = vpop.permute.xlu0 %1078 }
 0x185   : > { %1477 = vmatmul.mubr.msk.f32.vlgmr.msra.gmra.mxu1 %vm230_vm1, %v1079_v59 }
 0x186   : > { %1480 = vmatpush3.xpose.msk.msra.mxu1 %vm230_vm1, %v1162_v58  ;;  %1481 = vmatprep.mubr.msk.f32.mxu1 %vm1558_vm0, %v1557_v45 }
 0x18a   : > { %v1159_v60 = vpop.permute.xlu0 %1158 }
 0x18b   : > { %1482 = vmatmul.mubr.msk.f32.vlgmr.msra.gmra.mxu1 %vm230_vm1, %v1159_v60 }
 0x22c   : > { %v301_v61 = vpop.f32.mrf.mxu1 }
 0x22e   : > { %v1430_v62 = vpop.f32.mrf.mxu1 }
 0x230   : > { %v379_v63 = vpop.f32.mrf.mxu1 }
 0x231   : > { %v380_v0 = vadd.f32 %v379_v63, %v301_v61 }
 0x232   : > { %v1435_v1 = vpop.f32.mrf.mxu1 }
 0x233   : > { %v383_v5 = vsel %vm230_vm1, %v380_v0, -inf }
 0x234   : > { %384 = vmax.xlane.f32.xlu1 %v383_v5 }
 0x235   : > { %v577_v6 = vpop.f32.mrf.mxu1 }
 0x237   : > { %v1446_v8 = vpop.f32.mrf.mxu1 }
 0x239   : > { %v657_v9 = vpop.f32.mrf.mxu1 }
 0x23a   : > { %v658_v10 = vadd.f32 %v657_v9, %v577_v6 }
 0x23b   : > { %v1451_v11 = vpop.f32.mrf.mxu1 }
 0x23c   : > { %v661_v12 = vsel %vm230_vm1, %v658_v10, -inf }
 0x23d   : > { %662 = vmax.xlane.f32.xlu0 %v661_v12  ;;  %v865_v13 = vpop.f32.mrf.mxu1 }
 0x23f   : > { %v1462_v14 = vpop.f32.mrf.mxu1 }
 0x241   : > { %v945_v15 = vpop.f32.mrf.mxu1 }
 0x242   : > { %v946_v2 = vadd.f32 %v945_v15, %v865_v13 }
 0x243   : > { %v1467_v17 = vpop.f32.mrf.mxu1 }
 0x244   : > { %v949_v18 = vsel %vm230_vm1, %v946_v2, -inf }
 0x245   : > { %950 = vmax.xlane.f32.xlu0 %v949_v18  ;;  %v1153_v19 = vpop.f32.mrf.mxu1 }
 0x247   : > { %v1478_v21 = vpop.f32.mrf.mxu1 }
 0x24b   : > { %v1233_v22 = vpop.f32.mrf.mxu1 }
 0x24c   : > { %v1234_v23 = vadd.f32 %v1233_v22, %v1153_v19 }
 0x24d   : > { %v1483_v24 = vpop.f32.mrf.mxu1 }
 0x24e   : > { %v1237_v7 = vsel %vm230_vm1, %v1234_v23, -inf }
 0x24f   : > { %1238 = vmax.xlane.f32.xlu1 %v1237_v7 }
 0x2bd   : > { %v385_v25 = vpop.xlane.xlu1 %384 }
 0x2be   : > { %v386_v26 = vsub.f32 %v380_v0, %v385_v25 }
 0x2c0   : > { %v387_v28 = vmul.f32 1.442695, %v386_v26 }
 0x2c2   : > { %1518 = vpow2.f32 %v387_v28 }
 0x2c6   : > { %v663_v29 = vpop.xlane.xlu0 %662 }
 0x2c7   : > { %v664_v30 = vsub.f32 %v658_v10, %v663_v29 }
 0x2c9   : > { %v665_v16 = vmul.f32 1.442695, %v664_v30 }
 0x2cb   : > { %1520 = vpow2.f32 %v665_v16 }
 0x2ce   : > { %v951_v32 = vpop.xlane.xlu0 %950 }
 0x2cf   : > { %v1519_v33 = vpop.eup %1518  ;;  %v952_v34 = vsub.f32 %v946_v2, %v951_v32 }
 0x2d0   : > { %v389_v20 = vsel %vm230_vm1, %v1519_v33, 0.0 }
 0x2d1   : > { %v953_v35 = vmul.f32 1.442695, %v952_v34  ;;  %390 = vadd.xlane.f32.xlu0 %v389_v20 }
 0x2d3   : > { %1522 = vpow2.f32 %v953_v35 }
 0x2d8   : > { %v1521_v36 = vpop.eup %1520  ;;  %v1239_v43 = vpop.xlane.xlu1 %1238 }
 0x2d9   : > { %v667_v38 = vsel %vm230_vm1, %v1521_v36, 0.0  ;;  %v1240_v46 = vsub.f32 %v1234_v23, %v1239_v43 }
 0x2da   : > { %668 = vadd.xlane.f32.xlu1 %v667_v38 }
 0x2db   : > { %v1241_v31 = vmul.f32 1.442695, %v1240_v46 }
 0x2dd   : > { %1524 = vpow2.f32 %v1241_v31 }
 0x2e0   : > { %v1523_v39 = vpop.eup %1522 }
 0x2e1   : > { %v955_v40 = vsel %vm230_vm1, %v1523_v39, 0.0 }
 0x2e2   : > { %956 = vadd.xlane.f32.xlu0 %v955_v40 }
 0x2ea   : > { %v1525_v47 = vpop.eup %1524 }
 0x2eb   : > { %964 = vrot.lane.b32.xlu1 %v1515_v41, %s1548_s23  ;;  %v1243_v48 = vsel %vm230_vm1, %v1525_v47, 0.0 }
 0x2f8   : > { %676 = vrot.lane.b32.xlu0 %v1516_v44, %s1552_s30 }
 0x30f   : > { %1244 = vadd.xlane.f32.xlu1 %v1243_v48 }
 0x320   : > { %1252 = vrot.lane.b32.xlu1 %v1517_v49, %s1542_s16 }
 0x35a   : > { %v391_v50 = vpop.xlane.xlu0 %390 }
 0x35b   : > { %1526 = vrcp.f32 %v391_v50 }
 0x363   : > { %v669_v37 = vpop.xlane.xlu1 %668 }
 0x364   : > { %1528 = vrcp.f32 %v669_v37 }
 0x367   : > { %v965_v57 = vpop.permute.xlu1 %964 }
 0x368   : > { %v1527_v51 = vpop.eup %1526  ;;  %v970_v59 = vsel %vm398_vm2, %v965_v57, 0 }
 0x369   : > { %v393_v3 = vmul.f32 %v1527_v51, %v1519_v33 }
 0x36b   : > { %v957_v4 = vpop.xlane.xlu0 %956  ;;  %v394_v52 = vpack.c.bf16 %v393_v3, %v393_v3 }
 0x36c   : > { %1530 = vrcp.f32 %v957_v4 }
 0x36d   : > { %1439 = vmatmul.mubr.msk.bf16.vlgmr.msra.gmra.mxu0 %vm230_vm1, %v394_v52 }
 0x36e   : > { %1454 = vmatprep.mubr.msk.bf16.mxu0 %vm1558_vm0, %v1557_v45 }
 0x36f   : > { %v677_v53 = vpop.permute.xlu0 %676 }
 0x370   : > { %v682_v54 = vsel %vm398_vm2, %v677_v53, 0 }
 0x371   : > { %v1529_v55 = vpop.eup %1528  ;;  %1453 = vmatpush3.bf16.msra.mxu0 %v682_v54 }
 0x372   : > { %1468 = vmatprep.subr.bf16.mxu0 %v1557_v45  ;;  %v671_v56 = vmul.f32 %v1529_v55, %v1521_v36 }
 0x374   : > { %v672_v58 = vpack.c.bf16 %v671_v56, %v671_v56 }
 0x376   : > { %1455 = vmatmul.mubr.msk.bf16.vlgmr.msra.gmra.mxu0 %vm230_vm1, %v672_v58 }
 0x377   : > { %1469 = vmatpush3.bf16.msra.mxu0 %v970_v59  ;;  %1470 = vmatprep.mubr.msk.bf16.mxu0 %vm1558_vm0, %v1557_v45 }
 0x378   : > { %1484 = vmatprep.subr.bf16.mxu0 %v1557_v45 }
 0x379   : > { %v1531_v60 = vpop.eup %1530 }
 0x37a   : > { %v959_v61 = vmul.f32 %v1531_v60, %v1523_v39 }
 0x37c   : > { %v960_v62 = vpack.c.bf16 %v959_v61, %v959_v61 }
 0x37e   : > { %1471 = vmatmul.mubr.msk.bf16.vlgmr.msra.gmra.mxu0 %vm230_vm1, %v960_v62 }
 0x37f   : > { %1486 = vmatprep.mubr.msk.bf16.mxu0 %vm1558_vm0, %v1557_v45 }
 0x398   : > { %v1245_v63 = vpop.xlane.xlu1 %1244 }
 0x399   : > { %1532 = vrcp.f32 %v1245_v63 }
 0x39c   : > { %v1253_v0 = vpop.permute.xlu1 %1252 }
 0x39d   : > { %v1258_v1 = vsel %vm398_vm2, %v1253_v0, 0 }
 0x39e   : > { %1485 = vmatpush3.bf16.msra.mxu0 %v1258_v1 }
 0x3a6   : > { %v1533_v5 = vpop.eup %1532 }
 0x3a7   : > { %v1247_v6 = vmul.f32 %v1533_v5, %v1525_v47 }
 0x3a9   : > { %v1248_v8 = vpack.c.bf16 %v1247_v6, %v1247_v6 }
 0x3ab   : > { %1487 = vmatmul.mubr.msk.bf16.vlgmr.msra.gmra.mxu0 %vm230_vm1, %v1248_v8 }
 0x42d   : > { %v436_v9 = vpop.f32.mrf.mxu0 }
 0x42e   : > { %v442_v45 = vpack.c.bf16 %v436_v9, %v436_v9 }
 0x42f   : > { %v1440_v10 = vpop.f32.mrf.mxu0 }
 0x430   : > { %444 = vst.msk [vmem:[%s1815_s15] sm:$0xf] %vm443_vm3, %v442_v45 }
 0x431   : > { %v439_v11 = vpop.f32.mrf.mxu0 }
 0x433   : > { %v1441_v12 = vpop.f32.mrf.mxu0 }
 0x436   : > { %v718_v13 = vpop.f32.mrf.mxu0 }
 0x437   : > { %v1399_v14 = vpack.c.bf16 %v718_v13, %v718_v13 }
 0x438   : > { %v1456_v15 = vpop.f32.mrf.mxu0 }
 0x439   : > { %728 = vrot.lane.b32.xlu0 %v1399_v14, %s1545_s19 }
 0x43a   : > { %v721_v2 = vpop.f32.mrf.mxu0 }
 0x43c   : > { %v1457_v17 = vpop.f32.mrf.mxu0 }
 0x43e   : > { %v1006_v18 = vpop.f32.mrf.mxu0 }
 0x43f   : > { %v1400_v19 = vpack.c.bf16 %v1006_v18, %v1006_v18 }
 0x440   : > { %v1472_v21 = vpop.f32.mrf.mxu0 }
 0x441   : > { %1016 = vrot.lane.b32.xlu1 %v1400_v19, %s1549_s24 }
 0x442   : > { %v1009_v22 = vpop.f32.mrf.mxu0 }
 0x444   : > { %v1473_v23 = vpop.f32.mrf.mxu0 }
 0x46b   : > { %v1294_v24 = vpop.f32.mrf.mxu0 }
 0x46c   : > { %v1401_v7 = vpack.c.bf16 %v1294_v24, %v1294_v24 }
 0x46d   : > { %v1488_v25 = vpop.f32.mrf.mxu0 }
 0x46e   : > { %1304 = vrot.lane.b32.xlu0 %v1401_v7, %s1553_s4 }
 0x46f   : > { %v1297_v26 = vpop.f32.mrf.mxu0 }
 0x471   : > { %v1489_v28 = vpop.f32.mrf.mxu0 }
 0x4ab   : > { %v729_v29 = vpop.permute.xlu0 %728 }
 0x4ac   : > { %732 = vst.msk [vmem:[%s1815_s15] sm:$0xf] %vm731_vm4, %v729_v29 }
 0x4b3   : > { %v1017_v30 = vpop.permute.xlu1 %1016 }
 0x4b4   : > { %1020 = vst.msk [vmem:[%s1815_s15] sm:$0xf] %vm1019_vm5, %v1017_v30 }
 0x4e0   : > { %v1305_v16 = vpop.permute.xlu0 %1304 }
 0x4e1   : > { %1308 = vst.msk [vmem:[%s1815_s15] sm:$0xf] %vm1307_vm6, %v1305_v16 }
 0x4e2 PF: > { %s13_s12 = sadd.s32 1, %s1540_s12  }
 0x4e3   : > { %p10_p4 = scmp.ge.s32.totalorder %s13_s12, 4  }
 0x4e5   :  { %12 = sbr.rel (!%p10_p4) target bundleno = 1 (0x1), region = 62 }

// kernel: transformer_forward.17
= control target key start
LH: loop header
LB: loop body
LE: loop exit
PB: predicated region body
PF: predicated region fallthrough
CT: control target
= control target key end

     0   :  { %vm22_vm0 = vcmask 523264   ;;  %s251_s0 = inlined_call_operand.vmem [shape: bf16[16,64], index: 0, kind: input, shape index: {}]   ;;  %s252_s1 = inlined_call_operand.vmem [shape: bf16[1,64], index: 1, kind: input, shape index: {}]   ;;  %s253_s2 = inlined_call_operand.vmem [shape: bf16[64,128], index: 2, kind: input, shape index: {}]   ;;  %s254_s3 = inlined_call_operand.hbm [shape: f32[16,128], index: 3, kind: output, shape index: {}]  }
   0x1   :  { %v147_v0 = vld [vmem:[%s251_s0] sm:$0xff]  }
   0x2   :  { %v148_v1 = vunpack.c.l.bf16 %v147_v0  ;;  %v149_v2 = vunpack.c.h.bf16 %v147_v0 }
   0x4   :  { %v20_v3 = vmul.f32 %v148_v1, %v148_v1  ;;  %v21_v4 = vmul.f32 %v149_v2, %v149_v2 }
   0x5   :  { %8 = vsyncpa [#allocation3], 0  ;;  %v172_v7 = vld [vmem:[%s253_s2 + $0x18] sm:$0xff]   ;;  %v202_v8 = vmov 0.0   ;;  %vm203_vm1 = vmmov 0   ;;  %v173_v9 = vld [vmem:[%s253_s2 + $0x10] sm:$0xff]   ;;  %v40_v18 = vlaneseq }
   0x6   :  { %v23_v5 = vsel %vm22_vm0, %v20_v3, 0.0  ;;  %v26_v6 = vsel %vm22_vm0, %v21_v4, 0.0  ;;  %155 = vmatprep.subr.bf16.mxu0 %v202_v8  ;;  %163 = vmatprep.mubr.msk.bf16.mxu0 %vm203_vm1, %v202_v8  ;;  %v174_v10 = vld [vmem:[%s253_s2 + $0x8] sm:$0xff]   ;;  %v175_v11 = vld [vmem:[%s253_s2] sm:$0xff]   ;;  %s204_s2 = smov [#allocation2]  }
   0x7   :  { %24 = vadd.xlane.f32.xlu0 %v23_v5  ;;  %156 = vmatpush3.bf16.msra.mxu0 %v172_v7  ;;  %v41_v19 = vshrl.u32 %v40_v18, 7  ;;  %v38_v20 = vld [vmem:[%s252_s1] sm:$0x1]  ;;  %s130_s23 = sshll.u32 %s204_s2, 4  ;;  %s131_s23 = int_to_ptr.vmem [resolvable:$true] %s130_s23 }
   0x8   :  { %157 = vmatprep.subr.bf16.mxu0 %v202_v8  ;;  %v39_v21 = vunpack.c.l.bf16 %v38_v20  ;;  %s180_s1 = scalar_lea.vmem %s131_s23, 256  ;;  %p185_p1 = scmp.lt.s32.totalorder %s131_s23, %s131_s23 }
   0x9   :  { %v42_v22 = vsub.s32 0, %v41_v19  ;;  %p181_p0 = scmp.ne.s32.totalorder %s131_s23, %s180_s1  ;;  %p186_p2 = scmp.lt.s32.totalorder %s180_s1, %s180_s1 }
   0xb   :  { %27 = vadd.xlane.f32.xlu0 %v26_v6  ;;  %158 = vmatpush3.bf16.msra.mxu0 %v173_v9  ;;  %v43_v25 = vrot.slane %v39_v21, %v42_v22  ;;  %p187_p3 = por %p186_p2, %p185_p1 }
   0xc   :  { %159 = vmatprep.subr.bf16.mxu0 %v202_v8 }
   0xd   :  { %p188_p4 = pnand %p187_p3, %p181_p0 }
   0xf   :  { %160 = vmatpush3.bf16.msra.mxu0 %v174_v10 }
  0x10   :  { %161 = vmatprep.subr.bf16.mxu0 %v202_v8 }
  0x13   :  { %162 = vmatpush3.bf16.msra.mxu0 %v175_v11 }
  0x90   :  { %v25_v12 = vpop.xlane.xlu0 %24 }
  0x91   :  { %v30_v13 = vmul.f32 0.015625, %v25_v12 }
  0x93   :  { %v32_v14 = vadd.f32 1e-05, %v30_v13 }
  0x94   :  { %v28_v15 = vpop.xlane.xlu0 %27 }
  0x95   :  { %176 = vrsqrt.f32 %v32_v14  ;;  %v31_v16 = vmul.f32 0.015625, %v28_v15 }
  0x97   :  { %v33_v17 = vadd.f32 1e-05, %v31_v16 }
  0x99   :  { %178 = vrsqrt.f32 %v33_v17 }
  0xa2   :  { %v177_v23 = vpop.eup %176 }
  0xa3   :  { %v36_v24 = vmul.f32 %v177_v23, %v148_v1 }
  0xa5   :  { %v44_v28 = vmul.f32 %v43_v25, %v36_v24 }
  0xa6   :  { %v179_v26 = vpop.eup %178 }
  0xa7   :  { %v37_v27 = vmul.f32 %v179_v26, %v149_v2 }
  0xa9   :  { %v45_v29 = vmul.f32 %v43_v25, %v37_v27 }
  0xab   :  { %v46_v30 = vpack.c.bf16 %v45_v29, %v44_v28 }
  0xad   :  { %164 = vmatmul.mubr.msk.bf16.vlgmr.msra.gmra.mxu0 %vm22_vm0, %v46_v30 }
 0x16d   :  { %v116_v31 = vpop.f32.mrf.mxu0 }
 0x16e   :  { %123 = vst [vmem:[#allocation2] sm:$0xff] %v116_v31 }
 0x16f   :  { %v165_v32 = vpop.f32.mrf.mxu0 }
 0x171   :  { %v119_v33 = vpop.f32.mrf.mxu0 }
 0x172   :  { %124 = vst [vmem:[#allocation2 + $0x8] sm:$0xff] %v119_v33 }
 0x173   :  { %v166_v34 = vpop.f32.mrf.mxu0 }
 0x174   :  { %191 = shalt.err (!%p188_p4)
}
 0x175   :  { %s205_s24 = smov 128   ;;  %s206_s25 = smov 8  }
 0x176   :  { %136 = dma.vmem_to_hbm [thread:$0]  %s131_s23, 256, %s254_s3, [#allocation3], %s205_s24, %s205_s24, %s206_s25  }
 0x177   :  { %200 = dma.done.wait [#allocation3], 256  }
 0x178   :  { %201 = vsyncadd [#allocation3], 4294967040 }
 0x179   :  { %140 = vsyncpa [#allocation3], 1 }

// kernel: transformer_forward.15
= control target key start
LH: loop header
LB: loop body
LE: loop exit
PB: predicated region body
PF: predicated region fallthrough
CT: control target
= control target key end

     0   :  { %v156_v0 = vmov 0.0   ;;  %vm157_vm0 = vmmov 0   ;;  %vm58_vm1 = vcmask 523264   ;;  %vm111_vm2 = vcmask 519168   ;;  %s202_s1 = inlined_call_operand.vmem [shape: bf16[64,64], index: 1, kind: input, shape index: {}]   ;;  %s203_s0 = inlined_call_operand.vmem [shape: bf16[16,64], index: 0, kind: input, shape index: {}]   ;;  %s204_s2 = inlined_call_operand.vmem [shape: bf16[16,64], index: 2, kind: input, shape index: {}]   ;;  %s205_s3 = inlined_call_operand.vmem [shape: bf16[16,64], index: 3, kind: output, shape index: {}]  }
   0x1   :  { %137 = vmatprep.subr.bf16.mxu0 %v156_v0  ;;  %v151_v1 = vld [vmem:[%s202_s1 + $0x18] sm:$0xff]   ;;  %145 = vmatprep.mubr.msk.bf16.mxu0 %vm157_vm0, %v156_v0  ;;  %v152_v2 = vld [vmem:[%s202_s1 + $0x10] sm:$0xff]   ;;  %v153_v3 = vld [vmem:[%s202_s1 + $0x8] sm:$0xff]  }
   0x2   :  { %138 = vmatpush3.bf16.msra.mxu0 %v151_v1  ;;  %v154_v4 = vld [vmem:[%s202_s1] sm:$0xff]  }
   0x3   :  { %139 = vmatprep.subr.bf16.mxu0 %v156_v0  ;;  %v155_v5 = vld [vmem:[%s203_s0] sm:$0xff]  }
   0x4   :  { %v129_v6 = vld [vmem:[%s204_s2] sm:$0xff]  }
   0x5   :  { %v130_v7 = vunpack.c.l.bf16 %v129_v6  ;;  %v131_v10 = vunpack.c.h.bf16 %v129_v6 }
   0x6   :  { %140 = vmatpush3.bf16.msra.mxu0 %v152_v2 }
   0x7   :  { %141 = vmatprep.subr.bf16.mxu0 %v156_v0 }
   0xa   :  { %142 = vmatpush3.bf16.msra.mxu0 %v153_v3 }
   0xb   :  { %143 = vmatprep.subr.bf16.mxu0 %v156_v0 }
   0xe   :  { %144 = vmatpush3.bf16.msra.mxu0 %v154_v4 }
  0x11   :  { %146 = vmatmul.mubr.msk.bf16.vlgmr.msra.gmra.mxu0 %vm58_vm1, %v155_v5 }
  0xd1   :  { %v96_v8 = vpop.f32.mrf.mxu0 }
  0xd2   :  { %v97_v9 = vadd.f32 %v130_v7, %v96_v8 }
  0xd3   :  { %v147_v11 = vpop.f32.mrf.mxu0 }
  0xd4   :  { %v126_v12 = vpack.c.bf16 %v97_v9, %v97_v9 }
  0xd5   :  { %v99_v13 = vpop.f32.mrf.mxu0 }
  0xd6   :  { %112 = vst.msk [vmem:[%s205_s3] sm:$0xf] %vm111_vm2, %v126_v12  ;;  %v100_v14 = vadd.f32 %v131_v10, %v99_v13 }
  0xd7   :  { %v148_v15 = vpop.f32.mrf.mxu0 }
  0xd8   :  { %v127_v16 = vpack.c.bf16 %v100_v14, %v100_v14 }
  0xda   :  { %113 = vst.msk [vmem:[%s205_s3 + $0x4] sm:$0xf] %vm111_vm2, %v127_v16 }

</bundles_post_ra>
